<compile_context>
chip_gen: v6e
topology: v6e:2x2x1
jax: 0.10.0
libtpu: 0.0.40
codegen_flags: <defaults>
</compile_context>

<pallas_src>
import functools
import math

import jax
import jax.numpy as jnp
import numpy as np
from jax import lax
from jax.experimental import pallas as pl
from jax.experimental.pallas import tpu as pltpu

# ---- Global SNN constants (the PyTorch module relies on module-level globals
#      dt, taum, tau_d, vthr, T, spike_grad; fixed here deterministically). ----
DT = 1.0
TAUM = 10.0      # membrane time constant
TAU_D = 30.0     # synaptic decay time constant
TAU_R = 2.0      # rise time constant (filter == 'double')
VTHR = 0.5       # spike threshold
TREF = 2.0       # refractory period (module default tref=2)
T_STEPS = 16     # number of rate-coding timesteps


def _round_up(x, m):
    return ((x + m - 1) // m) * m


def _snn_kernel(spk_ref, win_t_ref, wr_t_ref, wout_t_ref, out_ref, i_in_ref,
                *, n_steps, bt, n_out, dt, lm, ld, lr, hsyn, vthr, tref):
    """Full T-step SNN forward for one batch tile.

    spk_ref   : (1, T*BT, Nin_pad) input spikes for this batch tile
    win_t_ref : (Nin_pad, H_pad)   Win.T  (zero padded)
    wr_t_ref  : (H_pad, H_pad)     Wr.T   (zero padded)
    wout_t_ref: (H_pad, O_pad)     Wout.T (zero padded)
    out_ref   : (BT, O_pad)        softmax over the n_out real classes
    i_in_ref  : (T*BT, H_pad)      VMEM scratch: hoisted input projection
    """
    h_pad = wr_t_ref.shape[1]
    o_pad = wout_t_ref.shape[1]
    f32 = jnp.float32

    # Hoisted input projection: all T timesteps in ONE MXU matmul
    # (M = T*BT rows, lane-dense K = Nin_pad).  Per-step slices below are
    # static, tile-aligned sublane reads.
    i_in_ref[...] = jnp.dot(spk_ref[0], win_t_ref[...],
                            preferred_element_type=f32)

    mem = jnp.zeros((bt, h_pad), f32)
    s = jnp.zeros((bt, h_pad), f32)
    r = jnp.zeros((bt, h_pad), f32)
    h = jnp.zeros((bt, h_pad), f32)
    tlast = jnp.full((bt, h_pad), -1.0, f32)
    rmax = jnp.full((bt, h_pad), -jnp.inf, f32)

    # Statically unrolled LIF recurrence (T is small and known at trace time).
    for t in range(n_steps):
        # I = Win @ spk[t] + Wr @ r   — only r @ Wr.T sits on the serial
        # critical path; the input term comes from the hoisted projection.
        I = (i_in_ref[pl.ds(t * bt, bt), :]
             + jnp.dot(r, wr_t_ref[...], preferred_element_type=f32))
        ti = dt * t

        # Refractory gate fused with (1 - s_prev): a single select replaces
        # two {0,1}-mask multiplies (semantically identical since s ∈ {0,1}).
        live = jnp.logical_and(ti > tlast + tref, s == 0.0)
        mem = jnp.where(live, lm * mem + (1.0 - lm) * I, 0.0)

        # filter == 'double' (uses previous-step spikes s)
        h = lr * h + hsyn * s
        r = ld * r + dt * h

        # spike_grad forward pass == Heaviside(mem - vthr)
        s = (mem - vthr > 0.0).astype(f32)
        tlast = jnp.where(s > 0.0, ti, tlast)
        rmax = jnp.maximum(rmax, r)                 # running max of R

    # Readout + lane-dense softmax.  Padded class lanes are masked to -inf so
    # they contribute exp(-inf) = 0 to the denominator.
    rout = jnp.dot(rmax, wout_t_ref[...], preferred_element_type=f32)
    col = lax.broadcasted_iota(jnp.int32, (bt, o_pad), 1)
    rout = jnp.where(col < n_out, rout, -jnp.inf)
    m = jnp.max(rout, axis=-1, keepdims=True)
    e = jnp.exp(rout - m)
    out_ref[...] = e / jnp.sum(e, axis=-1, keepdims=True)


def mdl_rnn_forward(spk_in, Win, Wr, Wout, *, batch_tile=None,
                    proj_dtype=jnp.float32):
    """spk_in: (T, B, N_in) float32 spikes.  Returns softmax(Wout @ rmax), (B, O)."""
    T, B, N_in = spk_in.shape
    H = Win.shape[0]
    O = Wout.shape[0]
    f32 = jnp.float32

    N_pad = _round_up(N_in, 128)   # lane-dense contraction for the projection
    H_pad = _round_up(H, 128)      # lane-dense hidden axis
    O_pad = _round_up(O, 128)      # lane-dense output stores

    # Batch tile: fill the MXU M dimension.  128 rows = full M on v5e, half on
    # v6e/v7x; use 64 if state writeback (ld/st slots) becomes the binding
    # resource at scale.  The grid axis is "parallel" so v7x's two TensorCores
    # each take a subset of the batch tiles.
    if batch_tile is None:
        batch_tile = min(_round_up(B, 8), 128)
    BT = batch_tile
    B_pad = _round_up(B, BT)
    n_tiles = B_pad // BT

    # Zero padding is semantically inert: padded inputs/neurons never spike,
    # padded weight rows/cols contribute exact zeros, padded batch rows and
    # class lanes are sliced off at the end.
    spk_p = jnp.zeros((T, B_pad, N_pad), proj_dtype).at[:, :B, :N_in].set(
        spk_in.astype(proj_dtype))
    # Wrapper-side layout plumbing: one contiguous (T*BT, N_pad) slab per
    # batch tile so the kernel's hoisted matmul needs no in-kernel reshape.
    spk_tiles = (spk_p.reshape(T, n_tiles, BT, N_pad)
                       .transpose(1, 0, 2, 3)
                       .reshape(n_tiles, T * BT, N_pad))

    win_t = jnp.zeros((N_pad, H_pad), proj_dtype).at[:N_in, :H].set(
        jnp.asarray(Win, proj_dtype).T)
    wr_t = jnp.zeros((H_pad, H_pad), f32).at[:H, :H].set(jnp.asarray(Wr, f32).T)
    wout_t = jnp.zeros((H_pad, O_pad), f32).at[:H, :O].set(
        jnp.asarray(Wout, f32).T)

    kernel = functools.partial(
        _snn_kernel,
        n_steps=T, bt=BT, n_out=O,
        dt=DT,
        lm=math.exp(-DT / TAUM),
        ld=math.exp(-DT / TAU_D),
        lr=math.exp(-DT / TAU_R),
        hsyn=DT / TAU_D / TAU_R,
        vthr=VTHR, tref=TREF)

    # Explicit VMEM budget (v7x: 64 MiB physical / 32 MiB default scoped).
    psize = jnp.dtype(proj_dtype).itemsize
    est = (2 * T * BT * N_pad * psize                       # spk tile (dbl buf)
           + T * BT * H_pad * 4                             # i_in scratch
           + 2 * (N_pad * H_pad * psize
                  + (H_pad * H_pad + H_pad * O_pad) * 4)    # weight tiles
           + 2 * BT * O_pad * 4                             # out tile (dbl buf)
           + 12 * BT * H_pad * 4)                           # states if spilled
    vmem_limit = int(min(64 * 1024 * 1024,
                         max(32 * 1024 * 1024, est + (8 << 20))))

    out = pl.pallas_call(
        kernel,
        out_shape=jax.ShapeDtypeStruct((B_pad, O_pad), f32),
        grid_spec=pltpu.PrefetchScalarGridSpec(
            num_scalar_prefetch=0,
            grid=(n_tiles,),
            in_specs=[
                pl.BlockSpec((1, T * BT, N_pad), lambda b: (b, 0, 0)),
                pl.BlockSpec((N_pad, H_pad), lambda b: (0, 0)),
                pl.BlockSpec((H_pad, H_pad), lambda b: (0, 0)),
                pl.BlockSpec((H_pad, O_pad), lambda b: (0, 0)),
            ],
            out_specs=pl.BlockSpec((BT, O_pad), lambda b: (b, 0)),
            scratch_shapes=[pltpu.VMEM((T * BT, H_pad), f32)],
        ),
        compiler_params=pltpu.CompilerParams(
            dimension_semantics=("parallel",),
            vmem_limit_bytes=vmem_limit),
    )(spk_tiles, win_t, wr_t, wout_t)

    return out[:B, :O]


def _reference_forward(spk_in, Win, Wr, Wout):
    """Pure-JAX reference matching the PyTorch loop (for a correctness check)."""
    T, B, _ = spk_in.shape
    H = Win.shape[0]
    lm, ld, lr = math.exp(-DT / TAUM), math.exp(-DT / TAU_D), math.exp(-DT / TAU_R)
    mem = jnp.zeros((B, H)); s = jnp.zeros((B, H)); r = jnp.zeros((B, H))
    h = jnp.zeros((B, H)); tlast = -jnp.ones((B, H))

    def step(carry, xs):
        mem, s, r, h, tlast = carry
        spk, i = xs
        I = spk @ Win.T + r @ Wr.T
        ti = DT * i
        mem = (ti > tlast + TREF).astype(jnp.float32) * (lm * mem + (1 - lm) * I) * (1 - s)
        h = lr * h + (DT / TAU_D / TAU_R) * s
        r = ld * r + DT * h
        s = (mem - VTHR > 0).astype(jnp.float32)
        tlast = tlast + (ti - tlast) * s
        return (mem, s, r, h, tlast), r

    _, R = jax.lax.scan(step, (mem, s, r, h, tlast),
                        (spk_in, jnp.arange(T, dtype=jnp.float32)))
    rm = jnp.max(R, axis=0)
    return jax.nn.softmax(rm @ Wout.T, axis=-1)


if __name__ == "__main__":
    # Small deterministic setup: input image 8x8 (N_in = 64), H = 32, 10 classes.
    B, C, S = 2, 1, 8
    N_in = C * S * S
    H, O, P = 32, 10, 4

    key = jax.random.PRNGKey(0)
    k_x, k_win, k_wout, k_pin, k_pout, k_l, k_spk = jax.random.split(key, 7)

    # Input image in [0, 1]   (PyTorch NCHW)
    x = jax.random.uniform(k_x, (B, C, S, S), dtype=jnp.float32)

    # Deterministic parameter init mirroring MDL_RNN_mnist.initialize()
    Win = jax.random.normal(k_win, (H, N_in)) / np.sqrt(H)
    Wout = jax.random.normal(k_wout, (O, H)) / np.sqrt(H)
    pin = jax.random.normal(k_pin, (H, P)) / np.sqrt(P)
    pout = jax.random.normal(k_pout, (H, P)) / np.sqrt(P)
    l = jax.random.normal(k_l, (P,)) * (np.sqrt(P) / np.sqrt(H))

    # mdl=1: low-rank connectivity Wr = (l * pin) @ pout.T   (param setup / glue)
    Wr = (l * pin) @ pout.T

    # spikegen.rate: Bernoulli spikes with p = pixel intensity, T timesteps (glue)
    x_flat = x.reshape(B, N_in)
    spk_in = jax.random.bernoulli(
        k_spk, p=x_flat, shape=(T_STEPS, B, N_in)).astype(jnp.float32)

    out = jax.block_until_ready(mdl_rnn_forward(spk_in, Win, Wr, Wout))
    ref = _reference_forward(spk_in, Win, Wr, Wout)
    np.testing.assert_allclose(np.asarray(out), np.asarray(ref), rtol=1e-5, atol=1e-5)

    # Structural check at a larger batch: exercises the batch grid (2 tiles of
    # 128 rows, "parallel" semantics) and the in-tile batch padding.
    B2 = 160
    k_x2, k_spk2 = jax.random.split(jax.random.PRNGKey(1), 2)
    x2 = jax.random.uniform(k_x2, (B2, N_in), dtype=jnp.float32)
    spk_in2 = jax.random.bernoulli(
        k_spk2, p=x2, shape=(T_STEPS, B2, N_in)).astype(jnp.float32)
    out2 = jax.block_until_ready(mdl_rnn_forward(spk_in2, Win, Wr, Wout))
    ref2 = _reference_forward(spk_in2, Win, Wr, Wout)
    np.testing.assert_allclose(np.asarray(out2), np.asarray(ref2), rtol=1e-5, atol=1e-5)

    print("KERNEL_OK")
</pallas_src>

<mosaic_0001>
module attributes {stable_mosaic.version = 11 : i64} {
  func.func @_snn_kernel(%arg0: i32, %arg1: memref<1x128x128xf32, #tpu.memory_space<vmem>>, %arg2: memref<128x128xf32, #tpu.memory_space<vmem>>, %arg3: memref<128x128xf32, #tpu.memory_space<vmem>>, %arg4: memref<128x128xf32, #tpu.memory_space<vmem>>, %arg5: memref<8x128xf32, #tpu.memory_space<vmem>>, %arg6: memref<128x128xf32, #tpu.memory_space<vmem>>) attributes {dimension_semantics = [#tpu.dimension_semantics<parallel>], iteration_bounds = array<i64: 1>, scalar_prefetch = 0 : i64, scratch_operands = 1 : i64, tpu.core_type = #tpu.core_type<tc>, window_params = [{transform_indices = @transform_0, window_bounds = array<i64: 1, 128, 128>}, {pipeline_mode = #tpu.pipeline_mode<synchronous>, transform_indices = @transform_1, window_bounds = array<i64: 128, 128>}, {pipeline_mode = #tpu.pipeline_mode<synchronous>, transform_indices = @transform_2, window_bounds = array<i64: 128, 128>}, {pipeline_mode = #tpu.pipeline_mode<synchronous>, transform_indices = @transform_3, window_bounds = array<i64: 128, 128>}, {transform_indices = @transform_4, window_bounds = array<i64: 8, 128>}]} {
    %c0 = arith.constant 0 : index
    %c0_0 = arith.constant 0 : index
    %c0_1 = arith.constant 0 : index
    %0 = vector.load %arg1[%c0, %c0_0, %c0_1] : memref<1x128x128xf32, #tpu.memory_space<vmem>>, vector<1x128x128xf32>
    %1 = vector.shape_cast %0 : vector<1x128x128xf32> to vector<128x128xf32>
    %c0_2 = arith.constant 0 : index
    %c0_3 = arith.constant 0 : index
    %2 = vector.load %arg2[%c0_2, %c0_3] : memref<128x128xf32, #tpu.memory_space<vmem>>, vector<128x128xf32>
    %cst = arith.constant dense<0.000000e+00> : vector<128x128xf32>
    %3 = tpu.matmul %1, %2, %cst {dimension_numbers = #tpu.dot_dimension_numbers<[1], [0], [0], [1], [0, 0, 1, 1], [], []>} : vector<128x128xf32>, vector<128x128xf32>, vector<128x128xf32> -> vector<128x128xf32>
    %c0_4 = arith.constant 0 : index
    %c0_5 = arith.constant 0 : index
    %4 = vector.load %arg6[%c0_4, %c0_5] : memref<128x128xf32, #tpu.memory_space<vmem>>, vector<128x128xf32>
    tpu.vector_store %arg6[%c0_4, %c0_5], %3 {strides = array<i32>} : memref<128x128xf32, #tpu.memory_space<vmem>>, vector<128x128xf32>,
    %cst_6 = arith.constant 0.000000e+00 : f32
    %5 = vector.broadcast %cst_6 : f32 to vector<8x128xf32>
    %cst_7 = arith.constant 0.000000e+00 : f32
    %6 = vector.broadcast %cst_7 : f32 to vector<8x128xf32>
    %cst_8 = arith.constant 0.000000e+00 : f32
    %7 = vector.broadcast %cst_8 : f32 to vector<8x128xf32>
    %cst_9 = arith.constant 0.000000e+00 : f32
    %8 = vector.broadcast %cst_9 : f32 to vector<8x128xf32>
    %cst_10 = arith.constant -1.000000e+00 : f32
    %9 = vector.broadcast %cst_10 : f32 to vector<8x128xf32>
    %cst_11 = arith.constant 0xFF800000 : f32
    %10 = vector.broadcast %cst_11 : f32 to vector<8x128xf32>
    %c0_12 = arith.constant 0 : index
    %c0_13 = arith.constant 0 : index
    %11 = vector.load %arg6[%c0_12, %c0_13] : memref<128x128xf32, #tpu.memory_space<vmem>>, vector<8x128xf32>
    %c0_14 = arith.constant 0 : index
    %c0_15 = arith.constant 0 : index
    %12 = vector.load %arg3[%c0_14, %c0_15] : memref<128x128xf32, #tpu.memory_space<vmem>>, vector<128x128xf32>
    %cst_16 = arith.constant dense<0.000000e+00> : vector<8x128xf32>
    %13 = tpu.matmul %7, %12, %cst_16 {dimension_numbers = #tpu.dot_dimension_numbers<[1], [0], [0], [1], [0, 0, 1, 1], [], []>} : vector<8x128xf32>, vector<128x128xf32>, vector<8x128xf32> -> vector<8x128xf32>
    %14 = arith.addf %11, %13 : vector<8x128xf32>
    %cst_17 = arith.constant 2.000000e+00 : f32
    %15 = vector.broadcast %cst_17 : f32 to vector<8x128xf32>
    %16 = arith.addf %9, %15 : vector<8x128xf32>
    %cst_18 = arith.constant 0.000000e+00 : f32
    %17 = vector.broadcast %cst_18 : f32 to vector<8x128xf32>
    %18 = arith.cmpf olt, %16, %17 : vector<8x128xf32>
    %cst_19 = arith.constant 0.000000e+00 : f32
    %19 = vector.broadcast %cst_19 : f32 to vector<8x128xf32>
    %20 = arith.cmpf oeq, %6, %19 : vector<8x128xf32>
    %21 = arith.andi %18, %20 : vector<8x128xi1>
    %cst_20 = arith.constant 0.904837429 : f32
    %22 = vector.broadcast %cst_20 : f32 to vector<8x128xf32>
    %23 = arith.mulf %22, %5 : vector<8x128xf32>
    %cst_21 = arith.constant 0.0951625854 : f32
    %24 = vector.broadcast %cst_21 : f32 to vector<8x128xf32>
    %25 = arith.mulf %24, %14 : vector<8x128xf32>
    %26 = arith.addf %23, %25 : vector<8x128xf32>
    %cst_22 = arith.constant 0.000000e+00 : f32
    %27 = vector.broadcast %cst_22 : f32 to vector<8x128xf32>
    %28 = arith.select %21, %26, %27 : vector<8x128xi1>, vector<8x128xf32>
    %cst_23 = arith.constant 0.606530666 : f32
    %29 = vector.broadcast %cst_23 : f32 to vector<8x128xf32>
    %30 = arith.mulf %29, %8 : vector<8x128xf32>
    %cst_24 = arith.constant 0.0166666675 : f32
    %31 = vector.broadcast %cst_24 : f32 to vector<8x128xf32>
    %32 = arith.mulf %31, %6 : vector<8x128xf32>
    %33 = arith.addf %30, %32 : vector<8x128xf32>
    %cst_25 = arith.constant 0.967216074 : f32
    %34 = vector.broadcast %cst_25 : f32 to vector<8x128xf32>
    %35 = arith.mulf %34, %7 : vector<8x128xf32>
    %cst_26 = arith.constant 1.000000e+00 : f32
    %36 = vector.broadcast %cst_26 : f32 to vector<8x128xf32>
    %37 = arith.mulf %36, %33 : vector<8x128xf32>
    %38 = arith.addf %35, %37 : vector<8x128xf32>
    %cst_27 = arith.constant 5.000000e-01 : f32
    %39 = vector.broadcast %cst_27 : f32 to vector<8x128xf32>
    %40 = arith.subf %28, %39 : vector<8x128xf32>
    %cst_28 = arith.constant 0.000000e+00 : f32
    %41 = vector.broadcast %cst_28 : f32 to vector<8x128xf32>
    %42 = arith.cmpf ogt, %40, %41 : vector<8x128xf32>
    %43 = arith.extui %42 : vector<8x128xi1> to vector<8x128xi32>
    %44 = arith.sitofp %43 : vector<8x128xi32> to vector<8x128xf32>
    %cst_29 = arith.constant 0.000000e+00 : f32
    %45 = vector.broadcast %cst_29 : f32 to vector<8x128xf32>
    %46 = arith.cmpf ogt, %44, %45 : vector<8x128xf32>
    %cst_30 = arith.constant 0.000000e+00 : f32
    %47 = vector.broadcast %cst_30 : f32 to vector<8x128xf32>
    %48 = arith.select %46, %47, %9 : vector<8x128xi1>, vector<8x128xf32>
    %49 = arith.maximumf %10, %38 : vector<8x128xf32>
    %c8 = arith.constant 8 : index
    %c0_31 = arith.constant 0 : index
    %50 = vector.load %arg6[%c8, %c0_31] : memref<128x128xf32, #tpu.memory_space<vmem>>, vector<8x128xf32>
    %c0_32 = arith.constant 0 : index
    %c0_33 = arith.constant 0 : index
    %51 = vector.load %arg3[%c0_32, %c0_33] : memref<128x128xf32, #tpu.memory_space<vmem>>, vector<128x128xf32>
    %cst_34 = arith.constant dense<0.000000e+00> : vector<8x128xf32>
    %52 = tpu.matmul %38, %51, %cst_34 {dimension_numbers = #tpu.dot_dimension_numbers<[1], [0], [0], [1], [0, 0, 1, 1], [], []>} : vector<8x128xf32>, vector<128x128xf32>, vector<8x128xf32> -> vector<8x128xf32>
    %53 = arith.addf %50, %52 : vector<8x128xf32>
    %cst_35 = arith.constant 2.000000e+00 : f32
    %54 = vector.broadcast %cst_35 : f32 to vector<8x128xf32>
    %55 = arith.addf %48, %54 : vector<8x128xf32>
    %cst_36 = arith.constant 1.000000e+00 : f32
    %56 = vector.broadcast %cst_36 : f32 to vector<8x128xf32>
    %57 = arith.cmpf olt, %55, %56 : vector<8x128xf32>
    %cst_37 = arith.constant 0.000000e+00 : f32
    %58 = vector.broadcast %cst_37 : f32 to vector<8x128xf32>
    %59 = arith.cmpf oeq, %44, %58 : vector<8x128xf32>
    %60 = arith.andi %57, %59 : vector<8x128xi1>
    %cst_38 = arith.constant 0.904837429 : f32
    %61 = vector.broadcast %cst_38 : f32 to vector<8x128xf32>
    %62 = arith.mulf %61, %28 : vector<8x128xf32>
    %cst_39 = arith.constant 0.0951625854 : f32
    %63 = vector.broadcast %cst_39 : f32 to vector<8x128xf32>
    %64 = arith.mulf %63, %53 : vector<8x128xf32>
    %65 = arith.addf %62, %64 : vector<8x128xf32>
    %cst_40 = arith.constant 0.000000e+00 : f32
    %66 = vector.broadcast %cst_40 : f32 to vector<8x128xf32>
    %67 = arith.select %60, %65, %66 : vector<8x128xi1>, vector<8x128xf32>
    %cst_41 = arith.constant 0.606530666 : f32
    %68 = vector.broadcast %cst_41 : f32 to vector<8x128xf32>
    %69 = arith.mulf %68, %33 : vector<8x128xf32>
    %cst_42 = arith.constant 0.0166666675 : f32
    %70 = vector.broadcast %cst_42 : f32 to vector<8x128xf32>
    %71 = arith.mulf %70, %44 : vector<8x128xf32>
    %72 = arith.addf %69, %71 : vector<8x128xf32>
    %cst_43 = arith.constant 0.967216074 : f32
    %73 = vector.broadcast %cst_43 : f32 to vector<8x128xf32>
    %74 = arith.mulf %73, %38 : vector<8x128xf32>
    %cst_44 = arith.constant 1.000000e+00 : f32
    %75 = vector.broadcast %cst_44 : f32 to vector<8x128xf32>
    %76 = arith.mulf %75, %72 : vector<8x128xf32>
    %77 = arith.addf %74, %76 : vector<8x128xf32>
    %cst_45 = arith.constant 5.000000e-01 : f32
    %78 = vector.broadcast %cst_45 : f32 to vector<8x128xf32>
    %79 = arith.subf %67, %78 : vector<8x128xf32>
    %cst_46 = arith.constant 0.000000e+00 : f32
    %80 = vector.broadcast %cst_46 : f32 to vector<8x128xf32>
    %81 = arith.cmpf ogt, %79, %80 : vector<8x128xf32>
    %82 = arith.extui %81 : vector<8x128xi1> to vector<8x128xi32>
    %83 = arith.sitofp %82 : vector<8x128xi32> to vector<8x128xf32>
    %cst_47 = arith.constant 0.000000e+00 : f32
    %84 = vector.broadcast %cst_47 : f32 to vector<8x128xf32>
    %85 = arith.cmpf ogt, %83, %84 : vector<8x128xf32>
    %cst_48 = arith.constant 1.000000e+00 : f32
    %86 = vector.broadcast %cst_48 : f32 to vector<8x128xf32>
    %87 = arith.select %85, %86, %48 : vector<8x128xi1>, vector<8x128xf32>
    %88 = arith.maximumf %49, %77 : vector<8x128xf32>
    %c16 = arith.constant 16 : index
    %c0_49 = arith.constant 0 : index
    %89 = vector.load %arg6[%c16, %c0_49] : memref<128x128xf32, #tpu.memory_space<vmem>>, vector<8x128xf32>
    %c0_50 = arith.constant 0 : index
    %c0_51 = arith.constant 0 : index
    %90 = vector.load %arg3[%c0_50, %c0_51] : memref<128x128xf32, #tpu.memory_space<vmem>>, vector<128x128xf32>
    %cst_52 = arith.constant dense<0.000000e+00> : vector<8x128xf32>
    %91 = tpu.matmul %77, %90, %cst_52 {dimension_numbers = #tpu.dot_dimension_numbers<[1], [0], [0], [1], [0, 0, 1, 1], [], []>} : vector<8x128xf32>, vector<128x128xf32>, vector<8x128xf32> -> vector<8x128xf32>
    %92 = arith.addf %89, %91 : vector<8x128xf32>
    %cst_53 = arith.constant 2.000000e+00 : f32
    %93 = vector.broadcast %cst_53 : f32 to vector<8x128xf32>
    %94 = arith.addf %87, %93 : vector<8x128xf32>
    %cst_54 = arith.constant 2.000000e+00 : f32
    %95 = vector.broadcast %cst_54 : f32 to vector<8x128xf32>
    %96 = arith.cmpf olt, %94, %95 : vector<8x128xf32>
    %cst_55 = arith.constant 0.000000e+00 : f32
    %97 = vector.broadcast %cst_55 : f32 to vector<8x128xf32>
    %98 = arith.cmpf oeq, %83, %97 : vector<8x128xf32>
    %99 = arith.andi %96, %98 : vector<8x128xi1>
    %cst_56 = arith.constant 0.904837429 : f32
    %100 = vector.broadcast %cst_56 : f32 to vector<8x128xf32>
    %101 = arith.mulf %100, %67 : vector<8x128xf32>
    %cst_57 = arith.constant 0.0951625854 : f32
    %102 = vector.broadcast %cst_57 : f32 to vector<8x128xf32>
    %103 = arith.mulf %102, %92 : vector<8x128xf32>
    %104 = arith.addf %101, %103 : vector<8x128xf32>
    %cst_58 = arith.constant 0.000000e+00 : f32
    %105 = vector.broadcast %cst_58 : f32 to vector<8x128xf32>
    %106 = arith.select %99, %104, %105 : vector<8x128xi1>, vector<8x128xf32>
    %cst_59 = arith.constant 0.606530666 : f32
    %107 = vector.broadcast %cst_59 : f32 to vector<8x128xf32>
    %108 = arith.mulf %107, %72 : vector<8x128xf32>
    %cst_60 = arith.constant 0.0166666675 : f32
    %109 = vector.broadcast %cst_60 : f32 to vector<8x128xf32>
    %110 = arith.mulf %109, %83 : vector<8x128xf32>
    %111 = arith.addf %108, %110 : vector<8x128xf32>
    %cst_61 = arith.constant 0.967216074 : f32
    %112 = vector.broadcast %cst_61 : f32 to vector<8x128xf32>
    %113 = arith.mulf %112, %77 : vector<8x128xf32>
    %cst_62 = arith.constant 1.000000e+00 : f32
    %114 = vector.broadcast %cst_62 : f32 to vector<8x128xf32>
    %115 = arith.mulf %114, %111 : vector<8x128xf32>
    %116 = arith.addf %113, %115 : vector<8x128xf32>
    %cst_63 = arith.constant 5.000000e-01 : f32
    %117 = vector.broadcast %cst_63 : f32 to vector<8x128xf32>
    %118 = arith.subf %106, %117 : vector<8x128xf32>
    %cst_64 = arith.constant 0.000000e+00 : f32
    %119 = vector.broadcast %cst_64 : f32 to vector<8x128xf32>
    %120 = arith.cmpf ogt, %118, %119 : vector<8x128xf32>
    %121 = arith.extui %120 : vector<8x128xi1> to vector<8x128xi32>
    %122 = arith.sitofp %121 : vector<8x128xi32> to vector<8x128xf32>
    %cst_65 = arith.constant 0.000000e+00 : f32
    %123 = vector.broadcast %cst_65 : f32 to vector<8x128xf32>
    %124 = arith.cmpf ogt, %122, %123 : vector<8x128xf32>
    %cst_66 = arith.constant 2.000000e+00 : f32
    %125 = vector.broadcast %cst_66 : f32 to vector<8x128xf32>
    %126 = arith.select %124, %125, %87 : vector<8x128xi1>, vector<8x128xf32>
    %127 = arith.maximumf %88, %116 : vector<8x128xf32>
    %c24 = arith.constant 24 : index
    %c0_67 = arith.constant 0 : index
    %128 = vector.load %arg6[%c24, %c0_67] : memref<128x128xf32, #tpu.memory_space<vmem>>, vector<8x128xf32>
    %c0_68 = arith.constant 0 : index
    %c0_69 = arith.constant 0 : index
    %129 = vector.load %arg3[%c0_68, %c0_69] : memref<128x128xf32, #tpu.memory_space<vmem>>, vector<128x128xf32>
    %cst_70 = arith.constant dense<0.000000e+00> : vector<8x128xf32>
    %130 = tpu.matmul %116, %129, %cst_70 {dimension_numbers = #tpu.dot_dimension_numbers<[1], [0], [0], [1], [0, 0, 1, 1], [], []>} : vector<8x128xf32>, vector<128x128xf32>, vector<8x128xf32> -> vector<8x128xf32>
    %131 = arith.addf %128, %130 : vector<8x128xf32>
    %cst_71 = arith.constant 2.000000e+00 : f32
    %132 = vector.broadcast %cst_71 : f32 to vector<8x128xf32>
    %133 = arith.addf %126, %132 : vector<8x128xf32>
    %cst_72 = arith.constant 3.000000e+00 : f32
    %134 = vector.broadcast %cst_72 : f32 to vector<8x128xf32>
    %135 = arith.cmpf olt, %133, %134 : vector<8x128xf32>
    %cst_73 = arith.constant 0.000000e+00 : f32
    %136 = vector.broadcast %cst_73 : f32 to vector<8x128xf32>
    %137 = arith.cmpf oeq, %122, %136 : vector<8x128xf32>
    %138 = arith.andi %135, %137 : vector<8x128xi1>
    %cst_74 = arith.constant 0.904837429 : f32
    %139 = vector.broadcast %cst_74 : f32 to vector<8x128xf32>
    %140 = arith.mulf %139, %106 : vector<8x128xf32>
    %cst_75 = arith.constant 0.0951625854 : f32
    %141 = vector.broadcast %cst_75 : f32 to vector<8x128xf32>
    %142 = arith.mulf %141, %131 : vector<8x128xf32>
    %143 = arith.addf %140, %142 : vector<8x128xf32>
    %cst_76 = arith.constant 0.000000e+00 : f32
    %144 = vector.broadcast %cst_76 : f32 to vector<8x128xf32>
    %145 = arith.select %138, %143, %144 : vector<8x128xi1>, vector<8x128xf32>
    %cst_77 = arith.constant 0.606530666 : f32
    %146 = vector.broadcast %cst_77 : f32 to vector<8x128xf32>
    %147 = arith.mulf %146, %111 : vector<8x128xf32>
    %cst_78 = arith.constant 0.0166666675 : f32
    %148 = vector.broadcast %cst_78 : f32 to vector<8x128xf32>
    %149 = arith.mulf %148, %122 : vector<8x128xf32>
    %150 = arith.addf %147, %149 : vector<8x128xf32>
    %cst_79 = arith.constant 0.967216074 : f32
    %151 = vector.broadcast %cst_79 : f32 to vector<8x128xf32>
    %152 = arith.mulf %151, %116 : vector<8x128xf32>
    %cst_80 = arith.constant 1.000000e+00 : f32
    %153 = vector.broadcast %cst_80 : f32 to vector<8x128xf32>
    %154 = arith.mulf %153, %150 : vector<8x128xf32>
    %155 = arith.addf %152, %154 : vector<8x128xf32>
    %cst_81 = arith.constant 5.000000e-01 : f32
    %156 = vector.broadcast %cst_81 : f32 to vector<8x128xf32>
    %157 = arith.subf %145, %156 : vector<8x128xf32>
    %cst_82 = arith.constant 0.000000e+00 : f32
    %158 = vector.broadcast %cst_82 : f32 to vector<8x128xf32>
    %159 = arith.cmpf ogt, %157, %158 : vector<8x128xf32>
    %160 = arith.extui %159 : vector<8x128xi1> to vector<8x128xi32>
    %161 = arith.sitofp %160 : vector<8x128xi32> to vector<8x128xf32>
    %cst_83 = arith.constant 0.000000e+00 : f32
    %162 = vector.broadcast %cst_83 : f32 to vector<8x128xf32>
    %163 = arith.cmpf ogt, %161, %162 : vector<8x128xf32>
    %cst_84 = arith.constant 3.000000e+00 : f32
    %164 = vector.broadcast %cst_84 : f32 to vector<8x128xf32>
    %165 = arith.select %163, %164, %126 : vector<8x128xi1>, vector<8x128xf32>
    %166 = arith.maximumf %127, %155 : vector<8x128xf32>
    %c32 = arith.constant 32 : index
    %c0_85 = arith.constant 0 : index
    %167 = vector.load %arg6[%c32, %c0_85] : memref<128x128xf32, #tpu.memory_space<vmem>>, vector<8x128xf32>
    %c0_86 = arith.constant 0 : index
    %c0_87 = arith.constant 0 : index
    %168 = vector.load %arg3[%c0_86, %c0_87] : memref<128x128xf32, #tpu.memory_space<vmem>>, vector<128x128xf32>
    %cst_88 = arith.constant dense<0.000000e+00> : vector<8x128xf32>
    %169 = tpu.matmul %155, %168, %cst_88 {dimension_numbers = #tpu.dot_dimension_numbers<[1], [0], [0], [1], [0, 0, 1, 1], [], []>} : vector<8x128xf32>, vector<128x128xf32>, vector<8x128xf32> -> vector<8x128xf32>
    %170 = arith.addf %167, %169 : vector<8x128xf32>
    %cst_89 = arith.constant 2.000000e+00 : f32
    %171 = vector.broadcast %cst_89 : f32 to vector<8x128xf32>
    %172 = arith.addf %165, %171 : vector<8x128xf32>
    %cst_90 = arith.constant 4.000000e+00 : f32
    %173 = vector.broadcast %cst_90 : f32 to vector<8x128xf32>
    %174 = arith.cmpf olt, %172, %173 : vector<8x128xf32>
    %cst_91 = arith.constant 0.000000e+00 : f32
    %175 = vector.broadcast %cst_91 : f32 to vector<8x128xf32>
    %176 = arith.cmpf oeq, %161, %175 : vector<8x128xf32>
    %177 = arith.andi %174, %176 : vector<8x128xi1>
    %cst_92 = arith.constant 0.904837429 : f32
    %178 = vector.broadcast %cst_92 : f32 to vector<8x128xf32>
    %179 = arith.mulf %178, %145 : vector<8x128xf32>
    %cst_93 = arith.constant 0.0951625854 : f32
    %180 = vector.broadcast %cst_93 : f32 to vector<8x128xf32>
    %181 = arith.mulf %180, %170 : vector<8x128xf32>
    %182 = arith.addf %179, %181 : vector<8x128xf32>
    %cst_94 = arith.constant 0.000000e+00 : f32
    %183 = vector.broadcast %cst_94 : f32 to vector<8x128xf32>
    %184 = arith.select %177, %182, %183 : vector<8x128xi1>, vector<8x128xf32>
    %cst_95 = arith.constant 0.606530666 : f32
    %185 = vector.broadcast %cst_95 : f32 to vector<8x128xf32>
    %186 = arith.mulf %185, %150 : vector<8x128xf32>
    %cst_96 = arith.constant 0.0166666675 : f32
    %187 = vector.broadcast %cst_96 : f32 to vector<8x128xf32>
    %188 = arith.mulf %187, %161 : vector<8x128xf32>
    %189 = arith.addf %186, %188 : vector<8x128xf32>
    %cst_97 = arith.constant 0.967216074 : f32
    %190 = vector.broadcast %cst_97 : f32 to vector<8x128xf32>
    %191 = arith.mulf %190, %155 : vector<8x128xf32>
    %cst_98 = arith.constant 1.000000e+00 : f32
    %192 = vector.broadcast %cst_98 : f32 to vector<8x128xf32>
    %193 = arith.mulf %192, %189 : vector<8x128xf32>
    %194 = arith.addf %191, %193 : vector<8x128xf32>
    %cst_99 = arith.constant 5.000000e-01 : f32
    %195 = vector.broadcast %cst_99 : f32 to vector<8x128xf32>
    %196 = arith.subf %184, %195 : vector<8x128xf32>
    %cst_100 = arith.constant 0.000000e+00 : f32
    %197 = vector.broadcast %cst_100 : f32 to vector<8x128xf32>
    %198 = arith.cmpf ogt, %196, %197 : vector<8x128xf32>
    %199 = arith.extui %198 : vector<8x128xi1> to vector<8x128xi32>
    %200 = arith.sitofp %199 : vector<8x128xi32> to vector<8x128xf32>
    %cst_101 = arith.constant 0.000000e+00 : f32
    %201 = vector.broadcast %cst_101 : f32 to vector<8x128xf32>
    %202 = arith.cmpf ogt, %200, %201 : vector<8x128xf32>
    %cst_102 = arith.constant 4.000000e+00 : f32
    %203 = vector.broadcast %cst_102 : f32 to vector<8x128xf32>
    %204 = arith.select %202, %203, %165 : vector<8x128xi1>, vector<8x128xf32>
    %205 = arith.maximumf %166, %194 : vector<8x128xf32>
    %c40 = arith.constant 40 : index
    %c0_103 = arith.constant 0 : index
    %206 = vector.load %arg6[%c40, %c0_103] : memref<128x128xf32, #tpu.memory_space<vmem>>, vector<8x128xf32>
    %c0_104 = arith.constant 0 : index
    %c0_105 = arith.constant 0 : index
    %207 = vector.load %arg3[%c0_104, %c0_105] : memref<128x128xf32, #tpu.memory_space<vmem>>, vector<128x128xf32>
    %cst_106 = arith.constant dense<0.000000e+00> : vector<8x128xf32>
    %208 = tpu.matmul %194, %207, %cst_106 {dimension_numbers = #tpu.dot_dimension_numbers<[1], [0], [0], [1], [0, 0, 1, 1], [], []>} : vector<8x128xf32>, vector<128x128xf32>, vector<8x128xf32> -> vector<8x128xf32>
    %209 = arith.addf %206, %208 : vector<8x128xf32>
    %cst_107 = arith.constant 2.000000e+00 : f32
    %210 = vector.broadcast %cst_107 : f32 to vector<8x128xf32>
    %211 = arith.addf %204, %210 : vector<8x128xf32>
    %cst_108 = arith.constant 5.000000e+00 : f32
    %212 = vector.broadcast %cst_108 : f32 to vector<8x128xf32>
    %213 = arith.cmpf olt, %211, %212 : vector<8x128xf32>
    %cst_109 = arith.constant 0.000000e+00 : f32
    %214 = vector.broadcast %cst_109 : f32 to vector<8x128xf32>
    %215 = arith.cmpf oeq, %200, %214 : vector<8x128xf32>
    %216 = arith.andi %213, %215 : vector<8x128xi1>
    %cst_110 = arith.constant 0.904837429 : f32
    %217 = vector.broadcast %cst_110 : f32 to vector<8x128xf32>
    %218 = arith.mulf %217, %184 : vector<8x128xf32>
    %cst_111 = arith.constant 0.0951625854 : f32
    %219 = vector.broadcast %cst_111 : f32 to vector<8x128xf32>
    %220 = arith.mulf %219, %209 : vector<8x128xf32>
    %221 = arith.addf %218, %220 : vector<8x128xf32>
    %cst_112 = arith.constant 0.000000e+00 : f32
    %222 = vector.broadcast %cst_112 : f32 to vector<8x128xf32>
    %223 = arith.select %216, %221, %222 : vector<8x128xi1>, vector<8x128xf32>
    %cst_113 = arith.constant 0.606530666 : f32
    %224 = vector.broadcast %cst_113 : f32 to vector<8x128xf32>
    %225 = arith.mulf %224, %189 : vector<8x128xf32>
    %cst_114 = arith.constant 0.0166666675 : f32
    %226 = vector.broadcast %cst_114 : f32 to vector<8x128xf32>
    %227 = arith.mulf %226, %200 : vector<8x128xf32>
    %228 = arith.addf %225, %227 : vector<8x128xf32>
    %cst_115 = arith.constant 0.967216074 : f32
    %229 = vector.broadcast %cst_115 : f32 to vector<8x128xf32>
    %230 = arith.mulf %229, %194 : vector<8x128xf32>
    %cst_116 = arith.constant 1.000000e+00 : f32
    %231 = vector.broadcast %cst_116 : f32 to vector<8x128xf32>
    %232 = arith.mulf %231, %228 : vector<8x128xf32>
    %233 = arith.addf %230, %232 : vector<8x128xf32>
    %cst_117 = arith.constant 5.000000e-01 : f32
    %234 = vector.broadcast %cst_117 : f32 to vector<8x128xf32>
    %235 = arith.subf %223, %234 : vector<8x128xf32>
    %cst_118 = arith.constant 0.000000e+00 : f32
    %236 = vector.broadcast %cst_118 : f32 to vector<8x128xf32>
    %237 = arith.cmpf ogt, %235, %236 : vector<8x128xf32>
    %238 = arith.extui %237 : vector<8x128xi1> to vector<8x128xi32>
    %239 = arith.sitofp %238 : vector<8x128xi32> to vector<8x128xf32>
    %cst_119 = arith.constant 0.000000e+00 : f32
    %240 = vector.broadcast %cst_119 : f32 to vector<8x128xf32>
    %241 = arith.cmpf ogt, %239, %240 : vector<8x128xf32>
    %cst_120 = arith.constant 5.000000e+00 : f32
    %242 = vector.broadcast %cst_120 : f32 to vector<8x128xf32>
    %243 = arith.select %241, %242, %204 : vector<8x128xi1>, vector<8x128xf32>
    %244 = arith.maximumf %205, %233 : vector<8x128xf32>
    %c48 = arith.constant 48 : index
    %c0_121 = arith.constant 0 : index
    %245 = vector.load %arg6[%c48, %c0_121] : memref<128x128xf32, #tpu.memory_space<vmem>>, vector<8x128xf32>
    %c0_122 = arith.constant 0 : index
    %c0_123 = arith.constant 0 : index
    %246 = vector.load %arg3[%c0_122, %c0_123] : memref<128x128xf32, #tpu.memory_space<vmem>>, vector<128x128xf32>
    %cst_124 = arith.constant dense<0.000000e+00> : vector<8x128xf32>
    %247 = tpu.matmul %233, %246, %cst_124 {dimension_numbers = #tpu.dot_dimension_numbers<[1], [0], [0], [1], [0, 0, 1, 1], [], []>} : vector<8x128xf32>, vector<128x128xf32>, vector<8x128xf32> -> vector<8x128xf32>
    %248 = arith.addf %245, %247 : vector<8x128xf32>
    %cst_125 = arith.constant 2.000000e+00 : f32
    %249 = vector.broadcast %cst_125 : f32 to vector<8x128xf32>
    %250 = arith.addf %243, %249 : vector<8x128xf32>
    %cst_126 = arith.constant 6.000000e+00 : f32
    %251 = vector.broadcast %cst_126 : f32 to vector<8x128xf32>
    %252 = arith.cmpf olt, %250, %251 : vector<8x128xf32>
    %cst_127 = arith.constant 0.000000e+00 : f32
    %253 = vector.broadcast %cst_127 : f32 to vector<8x128xf32>
    %254 = arith.cmpf oeq, %239, %253 : vector<8x128xf32>
    %255 = arith.andi %252, %254 : vector<8x128xi1>
    %cst_128 = arith.constant 0.904837429 : f32
    %256 = vector.broadcast %cst_128 : f32 to vector<8x128xf32>
    %257 = arith.mulf %256, %223 : vector<8x128xf32>
    %cst_129 = arith.constant 0.0951625854 : f32
    %258 = vector.broadcast %cst_129 : f32 to vector<8x128xf32>
    %259 = arith.mulf %258, %248 : vector<8x128xf32>
    %260 = arith.addf %257, %259 : vector<8x128xf32>
    %cst_130 = arith.constant 0.000000e+00 : f32
    %261 = vector.broadcast %cst_130 : f32 to vector<8x128xf32>
    %262 = arith.select %255, %260, %261 : vector<8x128xi1>, vector<8x128xf32>
    %cst_131 = arith.constant 0.606530666 : f32
    %263 = vector.broadcast %cst_131 : f32 to vector<8x128xf32>
    %264 = arith.mulf %263, %228 : vector<8x128xf32>
    %cst_132 = arith.constant 0.0166666675 : f32
    %265 = vector.broadcast %cst_132 : f32 to vector<8x128xf32>
    %266 = arith.mulf %265, %239 : vector<8x128xf32>
    %267 = arith.addf %264, %266 : vector<8x128xf32>
    %cst_133 = arith.constant 0.967216074 : f32
    %268 = vector.broadcast %cst_133 : f32 to vector<8x128xf32>
    %269 = arith.mulf %268, %233 : vector<8x128xf32>
    %cst_134 = arith.constant 1.000000e+00 : f32
    %270 = vector.broadcast %cst_134 : f32 to vector<8x128xf32>
    %271 = arith.mulf %270, %267 : vector<8x128xf32>
    %272 = arith.addf %269, %271 : vector<8x128xf32>
    %cst_135 = arith.constant 5.000000e-01 : f32
    %273 = vector.broadcast %cst_135 : f32 to vector<8x128xf32>
    %274 = arith.subf %262, %273 : vector<8x128xf32>
    %cst_136 = arith.constant 0.000000e+00 : f32
    %275 = vector.broadcast %cst_136 : f32 to vector<8x128xf32>
    %276 = arith.cmpf ogt, %274, %275 : vector<8x128xf32>
    %277 = arith.extui %276 : vector<8x128xi1> to vector<8x128xi32>
    %278 = arith.sitofp %277 : vector<8x128xi32> to vector<8x128xf32>
    %cst_137 = arith.constant 0.000000e+00 : f32
    %279 = vector.broadcast %cst_137 : f32 to vector<8x128xf32>
    %280 = arith.cmpf ogt, %278, %279 : vector<8x128xf32>
    %cst_138 = arith.constant 6.000000e+00 : f32
    %281 = vector.broadcast %cst_138 : f32 to vector<8x128xf32>
    %282 = arith.select %280, %281, %243 : vector<8x128xi1>, vector<8x128xf32>
    %283 = arith.maximumf %244, %272 : vector<8x128xf32>
    %c56 = arith.constant 56 : index
    %c0_139 = arith.constant 0 : index
    %284 = vector.load %arg6[%c56, %c0_139] : memref<128x128xf32, #tpu.memory_space<vmem>>, vector<8x128xf32>
    %c0_140 = arith.constant 0 : index
    %c0_141 = arith.constant 0 : index
    %285 = vector.load %arg3[%c0_140, %c0_141] : memref<128x128xf32, #tpu.memory_space<vmem>>, vector<128x128xf32>
    %cst_142 = arith.constant dense<0.000000e+00> : vector<8x128xf32>
    %286 = tpu.matmul %272, %285, %cst_142 {dimension_numbers = #tpu.dot_dimension_numbers<[1], [0], [0], [1], [0, 0, 1, 1], [], []>} : vector<8x128xf32>, vector<128x128xf32>, vector<8x128xf32> -> vector<8x128xf32>
    %287 = arith.addf %284, %286 : vector<8x128xf32>
    %cst_143 = arith.constant 2.000000e+00 : f32
    %288 = vector.broadcast %cst_143 : f32 to vector<8x128xf32>
    %289 = arith.addf %282, %288 : vector<8x128xf32>
    %cst_144 = arith.constant 7.000000e+00 : f32
    %290 = vector.broadcast %cst_144 : f32 to vector<8x128xf32>
    %291 = arith.cmpf olt, %289, %290 : vector<8x128xf32>
    %cst_145 = arith.constant 0.000000e+00 : f32
    %292 = vector.broadcast %cst_145 : f32 to vector<8x128xf32>
    %293 = arith.cmpf oeq, %278, %292 : vector<8x128xf32>
    %294 = arith.andi %291, %293 : vector<8x128xi1>
    %cst_146 = arith.constant 0.904837429 : f32
    %295 = vector.broadcast %cst_146 : f32 to vector<8x128xf32>
    %296 = arith.mulf %295, %262 : vector<8x128xf32>
    %cst_147 = arith.constant 0.0951625854 : f32
    %297 = vector.broadcast %cst_147 : f32 to vector<8x128xf32>
    %298 = arith.mulf %297, %287 : vector<8x128xf32>
    %299 = arith.addf %296, %298 : vector<8x128xf32>
    %cst_148 = arith.constant 0.000000e+00 : f32
    %300 = vector.broadcast %cst_148 : f32 to vector<8x128xf32>
    %301 = arith.select %294, %299, %300 : vector<8x128xi1>, vector<8x128xf32>
    %cst_149 = arith.constant 0.606530666 : f32
    %302 = vector.broadcast %cst_149 : f32 to vector<8x128xf32>
    %303 = arith.mulf %302, %267 : vector<8x128xf32>
    %cst_150 = arith.constant 0.0166666675 : f32
    %304 = vector.broadcast %cst_150 : f32 to vector<8x128xf32>
    %305 = arith.mulf %304, %278 : vector<8x128xf32>
    %306 = arith.addf %303, %305 : vector<8x128xf32>
    %cst_151 = arith.constant 0.967216074 : f32
    %307 = vector.broadcast %cst_151 : f32 to vector<8x128xf32>
    %308 = arith.mulf %307, %272 : vector<8x128xf32>
    %cst_152 = arith.constant 1.000000e+00 : f32
    %309 = vector.broadcast %cst_152 : f32 to vector<8x128xf32>
    %310 = arith.mulf %309, %306 : vector<8x128xf32>
    %311 = arith.addf %308, %310 : vector<8x128xf32>
    %cst_153 = arith.constant 5.000000e-01 : f32
    %312 = vector.broadcast %cst_153 : f32 to vector<8x128xf32>
    %313 = arith.subf %301, %312 : vector<8x128xf32>
    %cst_154 = arith.constant 0.000000e+00 : f32
    %314 = vector.broadcast %cst_154 : f32 to vector<8x128xf32>
    %315 = arith.cmpf ogt, %313, %314 : vector<8x128xf32>
    %316 = arith.extui %315 : vector<8x128xi1> to vector<8x128xi32>
    %317 = arith.sitofp %316 : vector<8x128xi32> to vector<8x128xf32>
    %cst_155 = arith.constant 0.000000e+00 : f32
    %318 = vector.broadcast %cst_155 : f32 to vector<8x128xf32>
    %319 = arith.cmpf ogt, %317, %318 : vector<8x128xf32>
    %cst_156 = arith.constant 7.000000e+00 : f32
    %320 = vector.broadcast %cst_156 : f32 to vector<8x128xf32>
    %321 = arith.select %319, %320, %282 : vector<8x128xi1>, vector<8x128xf32>
    %322 = arith.maximumf %283, %311 : vector<8x128xf32>
    %c64 = arith.constant 64 : index
    %c0_157 = arith.constant 0 : index
    %323 = vector.load %arg6[%c64, %c0_157] : memref<128x128xf32, #tpu.memory_space<vmem>>, vector<8x128xf32>
    %c0_158 = arith.constant 0 : index
    %c0_159 = arith.constant 0 : index
    %324 = vector.load %arg3[%c0_158, %c0_159] : memref<128x128xf32, #tpu.memory_space<vmem>>, vector<128x128xf32>
    %cst_160 = arith.constant dense<0.000000e+00> : vector<8x128xf32>
    %325 = tpu.matmul %311, %324, %cst_160 {dimension_numbers = #tpu.dot_dimension_numbers<[1], [0], [0], [1], [0, 0, 1, 1], [], []>} : vector<8x128xf32>, vector<128x128xf32>, vector<8x128xf32> -> vector<8x128xf32>
    %326 = arith.addf %323, %325 : vector<8x128xf32>
    %cst_161 = arith.constant 2.000000e+00 : f32
    %327 = vector.broadcast %cst_161 : f32 to vector<8x128xf32>
    %328 = arith.addf %321, %327 : vector<8x128xf32>
    %cst_162 = arith.constant 8.000000e+00 : f32
    %329 = vector.broadcast %cst_162 : f32 to vector<8x128xf32>
    %330 = arith.cmpf olt, %328, %329 : vector<8x128xf32>
    %cst_163 = arith.constant 0.000000e+00 : f32
    %331 = vector.broadcast %cst_163 : f32 to vector<8x128xf32>
    %332 = arith.cmpf oeq, %317, %331 : vector<8x128xf32>
    %333 = arith.andi %330, %332 : vector<8x128xi1>
    %cst_164 = arith.constant 0.904837429 : f32
    %334 = vector.broadcast %cst_164 : f32 to vector<8x128xf32>
    %335 = arith.mulf %334, %301 : vector<8x128xf32>
    %cst_165 = arith.constant 0.0951625854 : f32
    %336 = vector.broadcast %cst_165 : f32 to vector<8x128xf32>
    %337 = arith.mulf %336, %326 : vector<8x128xf32>
    %338 = arith.addf %335, %337 : vector<8x128xf32>
    %cst_166 = arith.constant 0.000000e+00 : f32
    %339 = vector.broadcast %cst_166 : f32 to vector<8x128xf32>
    %340 = arith.select %333, %338, %339 : vector<8x128xi1>, vector<8x128xf32>
    %cst_167 = arith.constant 0.606530666 : f32
    %341 = vector.broadcast %cst_167 : f32 to vector<8x128xf32>
    %342 = arith.mulf %341, %306 : vector<8x128xf32>
    %cst_168 = arith.constant 0.0166666675 : f32
    %343 = vector.broadcast %cst_168 : f32 to vector<8x128xf32>
    %344 = arith.mulf %343, %317 : vector<8x128xf32>
    %345 = arith.addf %342, %344 : vector<8x128xf32>
    %cst_169 = arith.constant 0.967216074 : f32
    %346 = vector.broadcast %cst_169 : f32 to vector<8x128xf32>
    %347 = arith.mulf %346, %311 : vector<8x128xf32>
    %cst_170 = arith.constant 1.000000e+00 : f32
    %348 = vector.broadcast %cst_170 : f32 to vector<8x128xf32>
    %349 = arith.mulf %348, %345 : vector<8x128xf32>
    %350 = arith.addf %347, %349 : vector<8x128xf32>
    %cst_171 = arith.constant 5.000000e-01 : f32
    %351 = vector.broadcast %cst_171 : f32 to vector<8x128xf32>
    %352 = arith.subf %340, %351 : vector<8x128xf32>
    %cst_172 = arith.constant 0.000000e+00 : f32
    %353 = vector.broadcast %cst_172 : f32 to vector<8x128xf32>
    %354 = arith.cmpf ogt, %352, %353 : vector<8x128xf32>
    %355 = arith.extui %354 : vector<8x128xi1> to vector<8x128xi32>
    %356 = arith.sitofp %355 : vector<8x128xi32> to vector<8x128xf32>
    %cst_173 = arith.constant 0.000000e+00 : f32
    %357 = vector.broadcast %cst_173 : f32 to vector<8x128xf32>
    %358 = arith.cmpf ogt, %356, %357 : vector<8x128xf32>
    %cst_174 = arith.constant 8.000000e+00 : f32
    %359 = vector.broadcast %cst_174 : f32 to vector<8x128xf32>
    %360 = arith.select %358, %359, %321 : vector<8x128xi1>, vector<8x128xf32>
    %361 = arith.maximumf %322, %350 : vector<8x128xf32>
    %c72 = arith.constant 72 : index
    %c0_175 = arith.constant 0 : index
    %362 = vector.load %arg6[%c72, %c0_175] : memref<128x128xf32, #tpu.memory_space<vmem>>, vector<8x128xf32>
    %c0_176 = arith.constant 0 : index
    %c0_177 = arith.constant 0 : index
    %363 = vector.load %arg3[%c0_176, %c0_177] : memref<128x128xf32, #tpu.memory_space<vmem>>, vector<128x128xf32>
    %cst_178 = arith.constant dense<0.000000e+00> : vector<8x128xf32>
    %364 = tpu.matmul %350, %363, %cst_178 {dimension_numbers = #tpu.dot_dimension_numbers<[1], [0], [0], [1], [0, 0, 1, 1], [], []>} : vector<8x128xf32>, vector<128x128xf32>, vector<8x128xf32> -> vector<8x128xf32>
    %365 = arith.addf %362, %364 : vector<8x128xf32>
    %cst_179 = arith.constant 2.000000e+00 : f32
    %366 = vector.broadcast %cst_179 : f32 to vector<8x128xf32>
    %367 = arith.addf %360, %366 : vector<8x128xf32>
    %cst_180 = arith.constant 9.000000e+00 : f32
    %368 = vector.broadcast %cst_180 : f32 to vector<8x128xf32>
    %369 = arith.cmpf olt, %367, %368 : vector<8x128xf32>
    %cst_181 = arith.constant 0.000000e+00 : f32
    %370 = vector.broadcast %cst_181 : f32 to vector<8x128xf32>
    %371 = arith.cmpf oeq, %356, %370 : vector<8x128xf32>
    %372 = arith.andi %369, %371 : vector<8x128xi1>
    %cst_182 = arith.constant 0.904837429 : f32
    %373 = vector.broadcast %cst_182 : f32 to vector<8x128xf32>
    %374 = arith.mulf %373, %340 : vector<8x128xf32>
    %cst_183 = arith.constant 0.0951625854 : f32
    %375 = vector.broadcast %cst_183 : f32 to vector<8x128xf32>
    %376 = arith.mulf %375, %365 : vector<8x128xf32>
    %377 = arith.addf %374, %376 : vector<8x128xf32>
    %cst_184 = arith.constant 0.000000e+00 : f32
    %378 = vector.broadcast %cst_184 : f32 to vector<8x128xf32>
    %379 = arith.select %372, %377, %378 : vector<8x128xi1>, vector<8x128xf32>
    %cst_185 = arith.constant 0.606530666 : f32
    %380 = vector.broadcast %cst_185 : f32 to vector<8x128xf32>
    %381 = arith.mulf %380, %345 : vector<8x128xf32>
    %cst_186 = arith.constant 0.0166666675 : f32
    %382 = vector.broadcast %cst_186 : f32 to vector<8x128xf32>
    %383 = arith.mulf %382, %356 : vector<8x128xf32>
    %384 = arith.addf %381, %383 : vector<8x128xf32>
    %cst_187 = arith.constant 0.967216074 : f32
    %385 = vector.broadcast %cst_187 : f32 to vector<8x128xf32>
    %386 = arith.mulf %385, %350 : vector<8x128xf32>
    %cst_188 = arith.constant 1.000000e+00 : f32
    %387 = vector.broadcast %cst_188 : f32 to vector<8x128xf32>
    %388 = arith.mulf %387, %384 : vector<8x128xf32>
    %389 = arith.addf %386, %388 : vector<8x128xf32>
    %cst_189 = arith.constant 5.000000e-01 : f32
    %390 = vector.broadcast %cst_189 : f32 to vector<8x128xf32>
    %391 = arith.subf %379, %390 : vector<8x128xf32>
    %cst_190 = arith.constant 0.000000e+00 : f32
    %392 = vector.broadcast %cst_190 : f32 to vector<8x128xf32>
    %393 = arith.cmpf ogt, %391, %392 : vector<8x128xf32>
    %394 = arith.extui %393 : vector<8x128xi1> to vector<8x128xi32>
    %395 = arith.sitofp %394 : vector<8x128xi32> to vector<8x128xf32>
    %cst_191 = arith.constant 0.000000e+00 : f32
    %396 = vector.broadcast %cst_191 : f32 to vector<8x128xf32>
    %397 = arith.cmpf ogt, %395, %396 : vector<8x128xf32>
    %cst_192 = arith.constant 9.000000e+00 : f32
    %398 = vector.broadcast %cst_192 : f32 to vector<8x128xf32>
    %399 = arith.select %397, %398, %360 : vector<8x128xi1>, vector<8x128xf32>
    %400 = arith.maximumf %361, %389 : vector<8x128xf32>
    %c80 = arith.constant 80 : index
    %c0_193 = arith.constant 0 : index
    %401 = vector.load %arg6[%c80, %c0_193] : memref<128x128xf32, #tpu.memory_space<vmem>>, vector<8x128xf32>
    %c0_194 = arith.constant 0 : index
    %c0_195 = arith.constant 0 : index
    %402 = vector.load %arg3[%c0_194, %c0_195] : memref<128x128xf32, #tpu.memory_space<vmem>>, vector<128x128xf32>
    %cst_196 = arith.constant dense<0.000000e+00> : vector<8x128xf32>
    %403 = tpu.matmul %389, %402, %cst_196 {dimension_numbers = #tpu.dot_dimension_numbers<[1], [0], [0], [1], [0, 0, 1, 1], [], []>} : vector<8x128xf32>, vector<128x128xf32>, vector<8x128xf32> -> vector<8x128xf32>
    %404 = arith.addf %401, %403 : vector<8x128xf32>
    %cst_197 = arith.constant 2.000000e+00 : f32
    %405 = vector.broadcast %cst_197 : f32 to vector<8x128xf32>
    %406 = arith.addf %399, %405 : vector<8x128xf32>
    %cst_198 = arith.constant 1.000000e+01 : f32
    %407 = vector.broadcast %cst_198 : f32 to vector<8x128xf32>
    %408 = arith.cmpf olt, %406, %407 : vector<8x128xf32>
    %cst_199 = arith.constant 0.000000e+00 : f32
    %409 = vector.broadcast %cst_199 : f32 to vector<8x128xf32>
    %410 = arith.cmpf oeq, %395, %409 : vector<8x128xf32>
    %411 = arith.andi %408, %410 : vector<8x128xi1>
    %cst_200 = arith.constant 0.904837429 : f32
    %412 = vector.broadcast %cst_200 : f32 to vector<8x128xf32>
    %413 = arith.mulf %412, %379 : vector<8x128xf32>
    %cst_201 = arith.constant 0.0951625854 : f32
    %414 = vector.broadcast %cst_201 : f32 to vector<8x128xf32>
    %415 = arith.mulf %414, %404 : vector<8x128xf32>
    %416 = arith.addf %413, %415 : vector<8x128xf32>
    %cst_202 = arith.constant 0.000000e+00 : f32
    %417 = vector.broadcast %cst_202 : f32 to vector<8x128xf32>
    %418 = arith.select %411, %416, %417 : vector<8x128xi1>, vector<8x128xf32>
    %cst_203 = arith.constant 0.606530666 : f32
    %419 = vector.broadcast %cst_203 : f32 to vector<8x128xf32>
    %420 = arith.mulf %419, %384 : vector<8x128xf32>
    %cst_204 = arith.constant 0.0166666675 : f32
    %421 = vector.broadcast %cst_204 : f32 to vector<8x128xf32>
    %422 = arith.mulf %421, %395 : vector<8x128xf32>
    %423 = arith.addf %420, %422 : vector<8x128xf32>
    %cst_205 = arith.constant 0.967216074 : f32
    %424 = vector.broadcast %cst_205 : f32 to vector<8x128xf32>
    %425 = arith.mulf %424, %389 : vector<8x128xf32>
    %cst_206 = arith.constant 1.000000e+00 : f32
    %426 = vector.broadcast %cst_206 : f32 to vector<8x128xf32>
    %427 = arith.mulf %426, %423 : vector<8x128xf32>
    %428 = arith.addf %425, %427 : vector<8x128xf32>
    %cst_207 = arith.constant 5.000000e-01 : f32
    %429 = vector.broadcast %cst_207 : f32 to vector<8x128xf32>
    %430 = arith.subf %418, %429 : vector<8x128xf32>
    %cst_208 = arith.constant 0.000000e+00 : f32
    %431 = vector.broadcast %cst_208 : f32 to vector<8x128xf32>
    %432 = arith.cmpf ogt, %430, %431 : vector<8x128xf32>
    %433 = arith.extui %432 : vector<8x128xi1> to vector<8x128xi32>
    %434 = arith.sitofp %433 : vector<8x128xi32> to vector<8x128xf32>
    %cst_209 = arith.constant 0.000000e+00 : f32
    %435 = vector.broadcast %cst_209 : f32 to vector<8x128xf32>
    %436 = arith.cmpf ogt, %434, %435 : vector<8x128xf32>
    %cst_210 = arith.constant 1.000000e+01 : f32
    %437 = vector.broadcast %cst_210 : f32 to vector<8x128xf32>
    %438 = arith.select %436, %437, %399 : vector<8x128xi1>, vector<8x128xf32>
    %439 = arith.maximumf %400, %428 : vector<8x128xf32>
    %c88 = arith.constant 88 : index
    %c0_211 = arith.constant 0 : index
    %440 = vector.load %arg6[%c88, %c0_211] : memref<128x128xf32, #tpu.memory_space<vmem>>, vector<8x128xf32>
    %c0_212 = arith.constant 0 : index
    %c0_213 = arith.constant 0 : index
    %441 = vector.load %arg3[%c0_212, %c0_213] : memref<128x128xf32, #tpu.memory_space<vmem>>, vector<128x128xf32>
    %cst_214 = arith.constant dense<0.000000e+00> : vector<8x128xf32>
    %442 = tpu.matmul %428, %441, %cst_214 {dimension_numbers = #tpu.dot_dimension_numbers<[1], [0], [0], [1], [0, 0, 1, 1], [], []>} : vector<8x128xf32>, vector<128x128xf32>, vector<8x128xf32> -> vector<8x128xf32>
    %443 = arith.addf %440, %442 : vector<8x128xf32>
    %cst_215 = arith.constant 2.000000e+00 : f32
    %444 = vector.broadcast %cst_215 : f32 to vector<8x128xf32>
    %445 = arith.addf %438, %444 : vector<8x128xf32>
    %cst_216 = arith.constant 1.100000e+01 : f32
    %446 = vector.broadcast %cst_216 : f32 to vector<8x128xf32>
    %447 = arith.cmpf olt, %445, %446 : vector<8x128xf32>
    %cst_217 = arith.constant 0.000000e+00 : f32
    %448 = vector.broadcast %cst_217 : f32 to vector<8x128xf32>
    %449 = arith.cmpf oeq, %434, %448 : vector<8x128xf32>
    %450 = arith.andi %447, %449 : vector<8x128xi1>
    %cst_218 = arith.constant 0.904837429 : f32
    %451 = vector.broadcast %cst_218 : f32 to vector<8x128xf32>
    %452 = arith.mulf %451, %418 : vector<8x128xf32>
    %cst_219 = arith.constant 0.0951625854 : f32
    %453 = vector.broadcast %cst_219 : f32 to vector<8x128xf32>
    %454 = arith.mulf %453, %443 : vector<8x128xf32>
    %455 = arith.addf %452, %454 : vector<8x128xf32>
    %cst_220 = arith.constant 0.000000e+00 : f32
    %456 = vector.broadcast %cst_220 : f32 to vector<8x128xf32>
    %457 = arith.select %450, %455, %456 : vector<8x128xi1>, vector<8x128xf32>
    %cst_221 = arith.constant 0.606530666 : f32
    %458 = vector.broadcast %cst_221 : f32 to vector<8x128xf32>
    %459 = arith.mulf %458, %423 : vector<8x128xf32>
    %cst_222 = arith.constant 0.0166666675 : f32
    %460 = vector.broadcast %cst_222 : f32 to vector<8x128xf32>
    %461 = arith.mulf %460, %434 : vector<8x128xf32>
    %462 = arith.addf %459, %461 : vector<8x128xf32>
    %cst_223 = arith.constant 0.967216074 : f32
    %463 = vector.broadcast %cst_223 : f32 to vector<8x128xf32>
    %464 = arith.mulf %463, %428 : vector<8x128xf32>
    %cst_224 = arith.constant 1.000000e+00 : f32
    %465 = vector.broadcast %cst_224 : f32 to vector<8x128xf32>
    %466 = arith.mulf %465, %462 : vector<8x128xf32>
    %467 = arith.addf %464, %466 : vector<8x128xf32>
    %cst_225 = arith.constant 5.000000e-01 : f32
    %468 = vector.broadcast %cst_225 : f32 to vector<8x128xf32>
    %469 = arith.subf %457, %468 : vector<8x128xf32>
    %cst_226 = arith.constant 0.000000e+00 : f32
    %470 = vector.broadcast %cst_226 : f32 to vector<8x128xf32>
    %471 = arith.cmpf ogt, %469, %470 : vector<8x128xf32>
    %472 = arith.extui %471 : vector<8x128xi1> to vector<8x128xi32>
    %473 = arith.sitofp %472 : vector<8x128xi32> to vector<8x128xf32>
    %cst_227 = arith.constant 0.000000e+00 : f32
    %474 = vector.broadcast %cst_227 : f32 to vector<8x128xf32>
    %475 = arith.cmpf ogt, %473, %474 : vector<8x128xf32>
    %cst_228 = arith.constant 1.100000e+01 : f32
    %476 = vector.broadcast %cst_228 : f32 to vector<8x128xf32>
    %477 = arith.select %475, %476, %438 : vector<8x128xi1>, vector<8x128xf32>
    %478 = arith.maximumf %439, %467 : vector<8x128xf32>
    %c96 = arith.constant 96 : index
    %c0_229 = arith.constant 0 : index
    %479 = vector.load %arg6[%c96, %c0_229] : memref<128x128xf32, #tpu.memory_space<vmem>>, vector<8x128xf32>
    %c0_230 = arith.constant 0 : index
    %c0_231 = arith.constant 0 : index
    %480 = vector.load %arg3[%c0_230, %c0_231] : memref<128x128xf32, #tpu.memory_space<vmem>>, vector<128x128xf32>
    %cst_232 = arith.constant dense<0.000000e+00> : vector<8x128xf32>
    %481 = tpu.matmul %467, %480, %cst_232 {dimension_numbers = #tpu.dot_dimension_numbers<[1], [0], [0], [1], [0, 0, 1, 1], [], []>} : vector<8x128xf32>, vector<128x128xf32>, vector<8x128xf32> -> vector<8x128xf32>
    %482 = arith.addf %479, %481 : vector<8x128xf32>
    %cst_233 = arith.constant 2.000000e+00 : f32
    %483 = vector.broadcast %cst_233 : f32 to vector<8x128xf32>
    %484 = arith.addf %477, %483 : vector<8x128xf32>
    %cst_234 = arith.constant 1.200000e+01 : f32
    %485 = vector.broadcast %cst_234 : f32 to vector<8x128xf32>
    %486 = arith.cmpf olt, %484, %485 : vector<8x128xf32>
    %cst_235 = arith.constant 0.000000e+00 : f32
    %487 = vector.broadcast %cst_235 : f32 to vector<8x128xf32>
    %488 = arith.cmpf oeq, %473, %487 : vector<8x128xf32>
    %489 = arith.andi %486, %488 : vector<8x128xi1>
    %cst_236 = arith.constant 0.904837429 : f32
    %490 = vector.broadcast %cst_236 : f32 to vector<8x128xf32>
    %491 = arith.mulf %490, %457 : vector<8x128xf32>
    %cst_237 = arith.constant 0.0951625854 : f32
    %492 = vector.broadcast %cst_237 : f32 to vector<8x128xf32>
    %493 = arith.mulf %492, %482 : vector<8x128xf32>
    %494 = arith.addf %491, %493 : vector<8x128xf32>
    %cst_238 = arith.constant 0.000000e+00 : f32
    %495 = vector.broadcast %cst_238 : f32 to vector<8x128xf32>
    %496 = arith.select %489, %494, %495 : vector<8x128xi1>, vector<8x128xf32>
    %cst_239 = arith.constant 0.606530666 : f32
    %497 = vector.broadcast %cst_239 : f32 to vector<8x128xf32>
    %498 = arith.mulf %497, %462 : vector<8x128xf32>
    %cst_240 = arith.constant 0.0166666675 : f32
    %499 = vector.broadcast %cst_240 : f32 to vector<8x128xf32>
    %500 = arith.mulf %499, %473 : vector<8x128xf32>
    %501 = arith.addf %498, %500 : vector<8x128xf32>
    %cst_241 = arith.constant 0.967216074 : f32
    %502 = vector.broadcast %cst_241 : f32 to vector<8x128xf32>
    %503 = arith.mulf %502, %467 : vector<8x128xf32>
    %cst_242 = arith.constant 1.000000e+00 : f32
    %504 = vector.broadcast %cst_242 : f32 to vector<8x128xf32>
    %505 = arith.mulf %504, %501 : vector<8x128xf32>
    %506 = arith.addf %503, %505 : vector<8x128xf32>
    %cst_243 = arith.constant 5.000000e-01 : f32
    %507 = vector.broadcast %cst_243 : f32 to vector<8x128xf32>
    %508 = arith.subf %496, %507 : vector<8x128xf32>
    %cst_244 = arith.constant 0.000000e+00 : f32
    %509 = vector.broadcast %cst_244 : f32 to vector<8x128xf32>
    %510 = arith.cmpf ogt, %508, %509 : vector<8x128xf32>
    %511 = arith.extui %510 : vector<8x128xi1> to vector<8x128xi32>
    %512 = arith.sitofp %511 : vector<8x128xi32> to vector<8x128xf32>
    %cst_245 = arith.constant 0.000000e+00 : f32
    %513 = vector.broadcast %cst_245 : f32 to vector<8x128xf32>
    %514 = arith.cmpf ogt, %512, %513 : vector<8x128xf32>
    %cst_246 = arith.constant 1.200000e+01 : f32
    %515 = vector.broadcast %cst_246 : f32 to vector<8x128xf32>
    %516 = arith.select %514, %515, %477 : vector<8x128xi1>, vector<8x128xf32>
    %517 = arith.maximumf %478, %506 : vector<8x128xf32>
    %c104 = arith.constant 104 : index
    %c0_247 = arith.constant 0 : index
    %518 = vector.load %arg6[%c104, %c0_247] : memref<128x128xf32, #tpu.memory_space<vmem>>, vector<8x128xf32>
    %c0_248 = arith.constant 0 : index
    %c0_249 = arith.constant 0 : index
    %519 = vector.load %arg3[%c0_248, %c0_249] : memref<128x128xf32, #tpu.memory_space<vmem>>, vector<128x128xf32>
    %cst_250 = arith.constant dense<0.000000e+00> : vector<8x128xf32>
    %520 = tpu.matmul %506, %519, %cst_250 {dimension_numbers = #tpu.dot_dimension_numbers<[1], [0], [0], [1], [0, 0, 1, 1], [], []>} : vector<8x128xf32>, vector<128x128xf32>, vector<8x128xf32> -> vector<8x128xf32>
    %521 = arith.addf %518, %520 : vector<8x128xf32>
    %cst_251 = arith.constant 2.000000e+00 : f32
    %522 = vector.broadcast %cst_251 : f32 to vector<8x128xf32>
    %523 = arith.addf %516, %522 : vector<8x128xf32>
    %cst_252 = arith.constant 1.300000e+01 : f32
    %524 = vector.broadcast %cst_252 : f32 to vector<8x128xf32>
    %525 = arith.cmpf olt, %523, %524 : vector<8x128xf32>
    %cst_253 = arith.constant 0.000000e+00 : f32
    %526 = vector.broadcast %cst_253 : f32 to vector<8x128xf32>
    %527 = arith.cmpf oeq, %512, %526 : vector<8x128xf32>
    %528 = arith.andi %525, %527 : vector<8x128xi1>
    %cst_254 = arith.constant 0.904837429 : f32
    %529 = vector.broadcast %cst_254 : f32 to vector<8x128xf32>
    %530 = arith.mulf %529, %496 : vector<8x128xf32>
    %cst_255 = arith.constant 0.0951625854 : f32
    %531 = vector.broadcast %cst_255 : f32 to vector<8x128xf32>
    %532 = arith.mulf %531, %521 : vector<8x128xf32>
    %533 = arith.addf %530, %532 : vector<8x128xf32>
    %cst_256 = arith.constant 0.000000e+00 : f32
    %534 = vector.broadcast %cst_256 : f32 to vector<8x128xf32>
    %535 = arith.select %528, %533, %534 : vector<8x128xi1>, vector<8x128xf32>
    %cst_257 = arith.constant 0.606530666 : f32
    %536 = vector.broadcast %cst_257 : f32 to vector<8x128xf32>
    %537 = arith.mulf %536, %501 : vector<8x128xf32>
    %cst_258 = arith.constant 0.0166666675 : f32
    %538 = vector.broadcast %cst_258 : f32 to vector<8x128xf32>
    %539 = arith.mulf %538, %512 : vector<8x128xf32>
    %540 = arith.addf %537, %539 : vector<8x128xf32>
    %cst_259 = arith.constant 0.967216074 : f32
    %541 = vector.broadcast %cst_259 : f32 to vector<8x128xf32>
    %542 = arith.mulf %541, %506 : vector<8x128xf32>
    %cst_260 = arith.constant 1.000000e+00 : f32
    %543 = vector.broadcast %cst_260 : f32 to vector<8x128xf32>
    %544 = arith.mulf %543, %540 : vector<8x128xf32>
    %545 = arith.addf %542, %544 : vector<8x128xf32>
    %cst_261 = arith.constant 5.000000e-01 : f32
    %546 = vector.broadcast %cst_261 : f32 to vector<8x128xf32>
    %547 = arith.subf %535, %546 : vector<8x128xf32>
    %cst_262 = arith.constant 0.000000e+00 : f32
    %548 = vector.broadcast %cst_262 : f32 to vector<8x128xf32>
    %549 = arith.cmpf ogt, %547, %548 : vector<8x128xf32>
    %550 = arith.extui %549 : vector<8x128xi1> to vector<8x128xi32>
    %551 = arith.sitofp %550 : vector<8x128xi32> to vector<8x128xf32>
    %cst_263 = arith.constant 0.000000e+00 : f32
    %552 = vector.broadcast %cst_263 : f32 to vector<8x128xf32>
    %553 = arith.cmpf ogt, %551, %552 : vector<8x128xf32>
    %cst_264 = arith.constant 1.300000e+01 : f32
    %554 = vector.broadcast %cst_264 : f32 to vector<8x128xf32>
    %555 = arith.select %553, %554, %516 : vector<8x128xi1>, vector<8x128xf32>
    %556 = arith.maximumf %517, %545 : vector<8x128xf32>
    %c112 = arith.constant 112 : index
    %c0_265 = arith.constant 0 : index
    %557 = vector.load %arg6[%c112, %c0_265] : memref<128x128xf32, #tpu.memory_space<vmem>>, vector<8x128xf32>
    %c0_266 = arith.constant 0 : index
    %c0_267 = arith.constant 0 : index
    %558 = vector.load %arg3[%c0_266, %c0_267] : memref<128x128xf32, #tpu.memory_space<vmem>>, vector<128x128xf32>
    %cst_268 = arith.constant dense<0.000000e+00> : vector<8x128xf32>
    %559 = tpu.matmul %545, %558, %cst_268 {dimension_numbers = #tpu.dot_dimension_numbers<[1], [0], [0], [1], [0, 0, 1, 1], [], []>} : vector<8x128xf32>, vector<128x128xf32>, vector<8x128xf32> -> vector<8x128xf32>
    %560 = arith.addf %557, %559 : vector<8x128xf32>
    %cst_269 = arith.constant 2.000000e+00 : f32
    %561 = vector.broadcast %cst_269 : f32 to vector<8x128xf32>
    %562 = arith.addf %555, %561 : vector<8x128xf32>
    %cst_270 = arith.constant 1.400000e+01 : f32
    %563 = vector.broadcast %cst_270 : f32 to vector<8x128xf32>
    %564 = arith.cmpf olt, %562, %563 : vector<8x128xf32>
    %cst_271 = arith.constant 0.000000e+00 : f32
    %565 = vector.broadcast %cst_271 : f32 to vector<8x128xf32>
    %566 = arith.cmpf oeq, %551, %565 : vector<8x128xf32>
    %567 = arith.andi %564, %566 : vector<8x128xi1>
    %cst_272 = arith.constant 0.904837429 : f32
    %568 = vector.broadcast %cst_272 : f32 to vector<8x128xf32>
    %569 = arith.mulf %568, %535 : vector<8x128xf32>
    %cst_273 = arith.constant 0.0951625854 : f32
    %570 = vector.broadcast %cst_273 : f32 to vector<8x128xf32>
    %571 = arith.mulf %570, %560 : vector<8x128xf32>
    %572 = arith.addf %569, %571 : vector<8x128xf32>
    %cst_274 = arith.constant 0.000000e+00 : f32
    %573 = vector.broadcast %cst_274 : f32 to vector<8x128xf32>
    %574 = arith.select %567, %572, %573 : vector<8x128xi1>, vector<8x128xf32>
    %cst_275 = arith.constant 0.606530666 : f32
    %575 = vector.broadcast %cst_275 : f32 to vector<8x128xf32>
    %576 = arith.mulf %575, %540 : vector<8x128xf32>
    %cst_276 = arith.constant 0.0166666675 : f32
    %577 = vector.broadcast %cst_276 : f32 to vector<8x128xf32>
    %578 = arith.mulf %577, %551 : vector<8x128xf32>
    %579 = arith.addf %576, %578 : vector<8x128xf32>
    %cst_277 = arith.constant 0.967216074 : f32
    %580 = vector.broadcast %cst_277 : f32 to vector<8x128xf32>
    %581 = arith.mulf %580, %545 : vector<8x128xf32>
    %cst_278 = arith.constant 1.000000e+00 : f32
    %582 = vector.broadcast %cst_278 : f32 to vector<8x128xf32>
    %583 = arith.mulf %582, %579 : vector<8x128xf32>
    %584 = arith.addf %581, %583 : vector<8x128xf32>
    %cst_279 = arith.constant 5.000000e-01 : f32
    %585 = vector.broadcast %cst_279 : f32 to vector<8x128xf32>
    %586 = arith.subf %574, %585 : vector<8x128xf32>
    %cst_280 = arith.constant 0.000000e+00 : f32
    %587 = vector.broadcast %cst_280 : f32 to vector<8x128xf32>
    %588 = arith.cmpf ogt, %586, %587 : vector<8x128xf32>
    %589 = arith.extui %588 : vector<8x128xi1> to vector<8x128xi32>
    %590 = arith.sitofp %589 : vector<8x128xi32> to vector<8x128xf32>
    %591 = arith.maximumf %556, %584 : vector<8x128xf32>
    %cst_281 = arith.constant 0.606530666 : f32
    %592 = vector.broadcast %cst_281 : f32 to vector<8x128xf32>
    %593 = arith.mulf %592, %579 : vector<8x128xf32>
    %cst_282 = arith.constant 0.0166666675 : f32
    %594 = vector.broadcast %cst_282 : f32 to vector<8x128xf32>
    %595 = arith.mulf %594, %590 : vector<8x128xf32>
    %596 = arith.addf %593, %595 : vector<8x128xf32>
    %cst_283 = arith.constant 0.967216074 : f32
    %597 = vector.broadcast %cst_283 : f32 to vector<8x128xf32>
    %598 = arith.mulf %597, %584 : vector<8x128xf32>
    %cst_284 = arith.constant 1.000000e+00 : f32
    %599 = vector.broadcast %cst_284 : f32 to vector<8x128xf32>
    %600 = arith.mulf %599, %596 : vector<8x128xf32>
    %601 = arith.addf %598, %600 : vector<8x128xf32>
    %602 = arith.maximumf %591, %601 : vector<8x128xf32>
    %c0_285 = arith.constant 0 : index
    %c0_286 = arith.constant 0 : index
    %603 = vector.load %arg4[%c0_285, %c0_286] : memref<128x128xf32, #tpu.memory_space<vmem>>, vector<128x128xf32>
    %cst_287 = arith.constant dense<0.000000e+00> : vector<8x128xf32>
    %604 = tpu.matmul %602, %603, %cst_287 {dimension_numbers = #tpu.dot_dimension_numbers<[1], [0], [0], [1], [0, 0, 1, 1], [], []>} : vector<8x128xf32>, vector<128x128xf32>, vector<8x128xf32> -> vector<8x128xf32>
    %605 = tpu.iota {dimensions = array<i32: 1>} : vector<8x128xi32>
    %c10_i32 = arith.constant 10 : i32
    %606 = vector.broadcast %c10_i32 : i32 to vector<8x128xi32>
    %607 = arith.cmpi slt, %605, %606 : vector<8x128xi32>
    %cst_288 = arith.constant 0xFF800000 : f32
    %608 = vector.broadcast %cst_288 : f32 to vector<8x128xf32>
    %609 = arith.select %607, %604, %608 : vector<8x128xi1>, vector<8x128xf32>
    %cst_289 = arith.constant dense<0xFF800000> : vector<8xf32>
    %610 = vector.multi_reduction <maximumf>, %609, %cst_289 [1] : vector<8x128xf32> to vector<8xf32>
    %611 = vector.shape_cast %610 : vector<8xf32> to vector<8x1xf32>
    %612 = vector.broadcast %611 : vector<8x1xf32> to vector<8x128xf32>
    %613 = arith.subf %609, %612 : vector<8x128xf32>
    %614 = math.exp %613 : vector<8x128xf32>
    %cst_290 = arith.constant dense<0.000000e+00> : vector<8xf32>
    %615 = vector.multi_reduction <add>, %614, %cst_290 [1] : vector<8x128xf32> to vector<8xf32>
    %616 = vector.shape_cast %615 : vector<8xf32> to vector<8x1xf32>
    %617 = vector.broadcast %616 : vector<8x1xf32> to vector<8x128xf32>
    %618 = arith.divf %614, %617 : vector<8x128xf32>
    %c0_291 = arith.constant 0 : index
    %c0_292 = arith.constant 0 : index
    %619 = vector.load %arg5[%c0_291, %c0_292] : memref<8x128xf32, #tpu.memory_space<vmem>>, vector<8x128xf32>
    tpu.vector_store %arg5[%c0_291, %c0_292], %618 {strides = array<i32>} : memref<8x128xf32, #tpu.memory_space<vmem>>, vector<8x128xf32>,
    return
  }
  func.func @transform_0(%arg0: i32) -> (i32, i32, i32) {
    %c0_i32 = arith.constant 0 : i32
    %c0_i32_0 = arith.constant 0 : i32
    %c0_i32_1 = arith.constant 0 : i32
    return %arg0, %c0_i32, %c0_i32_0 : i32, i32, i32
  }
  func.func @transform_1(%arg0: i32) -> (i32, i32) {
    %c0_i32 = arith.constant 0 : i32
    %c0_i32_0 = arith.constant 0 : i32
    %c0_i32_1 = arith.constant 0 : i32
    return %c0_i32, %c0_i32_0 : i32, i32
  }
  func.func @transform_2(%arg0: i32) -> (i32, i32) {
    %c0_i32 = arith.constant 0 : i32
    %c0_i32_0 = arith.constant 0 : i32
    %c0_i32_1 = arith.constant 0 : i32
    return %c0_i32, %c0_i32_0 : i32, i32
  }
  func.func @transform_3(%arg0: i32) -> (i32, i32) {
    %c0_i32 = arith.constant 0 : i32
    %c0_i32_0 = arith.constant 0 : i32
    %c0_i32_1 = arith.constant 0 : i32
    return %c0_i32, %c0_i32_0 : i32, i32
  }
  func.func @transform_4(%arg0: i32) -> (i32, i32) {
    %c0_i32 = arith.constant 0 : i32
    %c0_i32_0 = arith.constant 0 : i32
    return %arg0, %c0_i32 : i32, i32
  }
}

</mosaic_0001>

<bundles_post_ra>
// kernel: tpu_custom_call.1
= control target key start
LH: loop header
LB: loop body
LE: loop exit
PB: predicated region body
PF: predicated region fallthrough
CT: control target
= control target key end

     0   :  { %9 = vsyncpa [#allocation4], 0  ;;  %s3525_s0 = inlined_call_operand.hbm [shape: f32[1,128,128], index: 0, kind: input, shape index: {}]   ;;  %s3526_s1 = inlined_call_operand.hbm [shape: f32[128,128], index: 1, kind: input, shape index: {}]   ;;  %s3527_s2 = inlined_call_operand.hbm [shape: f32[128,128], index: 2, kind: input, shape index: {}]   ;;  %s3528_s3 = inlined_call_operand.hbm [shape: f32[128,128], index: 3, kind: input, shape index: {}]   ;;  %s3529_s4 = inlined_call_operand.hbm [shape: f32[8,128], index: 4, kind: output, shape index: {}]  }
   0x1   :  { %10 = vsyncpa [#allocation7], 0 }
   0x2   :  { %11 = vsyncpa [#allocation10], 0 }
   0x3   :  { %12 = vsyncpa [#allocation5], 0  ;;  %s2735_s15 = smov [#allocation6]   ;;  %s2736_s17 = smov [#allocation3]  }
   0x4   :  { %s30_s16 = sshll.u32 %s2735_s15, 4  ;;  %s18_s18 = sshll.u32 %s2736_s17, 4  ;;  %s31_s16 = int_to_ptr.vmem [resolvable:$true] %s30_s16  ;;  %s19_s18 = int_to_ptr.vmem [resolvable:$true] %s18_s18 }
   0x5   :  { %s2635_s19 = scalar_lea.vmem %s31_s16, 2048  ;;  %p2640_p1 = scmp.lt.s32.totalorder %s31_s16, %s31_s16 }
   0x6   :  { %p2636_p0 = scmp.ne.s32.totalorder %s31_s16, %s2635_s19  ;;  %p2641_p2 = scmp.lt.s32.totalorder %s2635_s19, %s2635_s19 }
   0x8   :  { %p2642_p3 = por %p2641_p2, %p2640_p1 }
   0xa   :  { %p2643_p4 = pnand %p2642_p3, %p2636_p0 }
   0xc   :  { %2646 = shalt.err (!%p2643_p4)
}
   0xd   :  { %s2737_s20 = smov 128   ;;  %s2738_s21 = smov 8  }
   0xe   :  { %36 = dma.hbm_to_vmem [thread:$0]  %s3526_s1, 2048, %s31_s16, [#allocation7], %s2737_s20, %s2737_s20, %s2738_s21  }
   0xf   :  { %s2655_s24 = scalar_lea.vmem %s19_s18, 2048  ;;  %p2660_p6 = scmp.lt.s32.totalorder %s19_s18, %s19_s18 }
  0x10   :  { %p2656_p5 = scmp.ne.s32.totalorder %s19_s18, %s2655_s24  ;;  %p2661_p7 = scmp.lt.s32.totalorder %s2655_s24, %s2655_s24 }
  0x12   :  { %p2662_p8 = por %p2661_p7, %p2660_p6 }
  0x14   :  { %p2663_p9 = pnand %p2662_p8, %p2656_p5 }
  0x16   :  { %2666 = shalt.err (!%p2663_p9)
}
  0x17   :  { %24 = dma.hbm_to_vmem [thread:$0]  %s3525_s0, 2048, %s19_s18, [#allocation4], %s2737_s20, %s2737_s20, %s2738_s21  }
  0x18   :  { %s2739_s27 = smov [#allocation8]   ;;  %s2740_s29 = smov [#allocation9]  }
  0x19   :  { %s42_s28 = sshll.u32 %s2739_s27, 4  ;;  %s54_s30 = sshll.u32 %s2740_s29, 4  ;;  %s43_s28 = int_to_ptr.vmem [resolvable:$true] %s42_s28  ;;  %s55_s30 = int_to_ptr.vmem [resolvable:$true] %s54_s30 }
  0x1a   :  { %s2675_s1 = scalar_lea.vmem %s43_s28, 2048  ;;  %p2680_p11 = scmp.lt.s32.totalorder %s43_s28, %s43_s28 }
  0x1b   :  { %p2676_p10 = scmp.ne.s32.totalorder %s43_s28, %s2675_s1  ;;  %p2681_p12 = scmp.lt.s32.totalorder %s2675_s1, %s2675_s1 }
  0x1d   :  { %p2682_p13 = por %p2681_p12, %p2680_p11 }
  0x1f   :  { %p2683_p0 = pnand %p2682_p13, %p2676_p10 }
  0x21   :  { %2686 = shalt.err (!%p2683_p0)
}
  0x22   :  { %48 = dma.hbm_to_vmem [thread:$0]  %s3527_s2, 2048, %s43_s28, [#allocation7], %s2737_s20, %s2737_s20, %s2738_s21  }
  0x23   :  { %s2695_s0 = scalar_lea.vmem %s55_s30, 2048  ;;  %p2700_p2 = scmp.lt.s32.totalorder %s55_s30, %s55_s30 }
  0x24   :  { %p2696_p1 = scmp.ne.s32.totalorder %s55_s30, %s2695_s0  ;;  %p2701_p3 = scmp.lt.s32.totalorder %s2695_s0, %s2695_s0 }
  0x26   :  { %p2702_p4 = por %p2701_p3, %p2700_p2 }
  0x28   :  { %p2703_p5 = pnand %p2702_p4, %p2696_p1 }
  0x2a   :  { %2706 = shalt.err (!%p2703_p5)
}
  0x2b   :  { %60 = dma.hbm_to_vmem [thread:$0]  %s3528_s3, 2048, %s55_s30, [#allocation10], %s2737_s20, %s2737_s20, %s2738_s21  }
  0x2c   :  { %2727 = dma.done.wait [#allocation4], 2048  }
  0x2d   :  { %2728 = vsyncadd [#allocation4], 4294965248 }
  0x2e   :  { %2729 = dma.done.wait [#allocation7], 4096  }
  0x2f   :  { %2730 = vsyncadd [#allocation7], 4294963200 }
  0x30   :  { %2731 = dma.done.wait [#allocation10], 2048  }
  0x31   :  { %2732 = vsyncadd [#allocation10], 4294965248  ;;  %v2741_v0 = vmov 0.0   ;;  %vm2742_vm0 = vmmov 0   ;;  %v104_v1 = vld [vmem:[#allocation6 + $0x78] sm:$0xff]  ;;  %v103_v3 = vld [vmem:[#allocation6 + $0x70] sm:$0xff] }
  0x32   :  { %2072 = vmatprep.subr.mxu1 %v2741_v0  ;;  %2104 = vmatprep.mubr.msk.f32.mxu1 %vm2742_vm0, %v2741_v0  ;;  %v2797_v2 = vld [vmem:[#allocation8 + $0x78] sm:$0xff]  ;;  %v2800_v4 = vld [vmem:[#allocation8 + $0x70] sm:$0xff]  ;;  %v102_v5 = vld [vmem:[#allocation6 + $0x68] sm:$0xff]  ;;  %s2744_s2 = smov [#allocation11]  }
  0x33   :  { %2016 = vmatprep.subr.mxu0 %v104_v1  ;;  %2073 = vmatpush3.msra.mxu1 %v2797_v2  ;;  %v2803_v6 = vld [vmem:[#allocation8 + $0x68] sm:$0xff]  ;;  %v101_v7 = vld [vmem:[#allocation6 + $0x60] sm:$0xff]  ;;  %v100_v9 = vld [vmem:[#allocation6 + $0x58] sm:$0xff]  ;;  %s1692_s3 = sshll.u32 %s2744_s2, 4  ;;  %s1693_s3 = int_to_ptr.vmem [resolvable:$true] %s1692_s3 }
  0x34   :  { %2017 = vmatpush3.msra.mxu0 %v104_v1  ;;  %2074 = vmatprep.subr.mxu1 %v2741_v0  ;;  %v2807_v8 = vld [vmem:[#allocation8 + $0x60] sm:$0xff]  ;;  %v2811_v10 = vld [vmem:[#allocation8 + $0x58] sm:$0xff]  ;;  %v99_v11 = vld [vmem:[#allocation6 + $0x50] sm:$0xff]  ;;  %s2707_s9 = scalar_lea.vmem %s1693_s3, 128  ;;  %p2712_p7 = scmp.lt.s32.totalorder %s1693_s3, %s1693_s3 }
  0x35   :  { %2018 = vmatprep.subr.mxu0 %v103_v3  ;;  %2075 = vmatpush3.msra.mxu1 %v2800_v4  ;;  %v2815_v12 = vld [vmem:[#allocation8 + $0x50] sm:$0xff]  ;;  %v98_v13 = vld [vmem:[#allocation6 + $0x48] sm:$0xff]  ;;  %v97_v15 = vld [vmem:[#allocation6 + $0x40] sm:$0xff]  ;;  %p2708_p6 = scmp.ne.s32.totalorder %s1693_s3, %s2707_s9  ;;  %p2713_p8 = scmp.lt.s32.totalorder %s2707_s9, %s2707_s9 }
  0x36   :  { %2019 = vmatpush3.msra.mxu0 %v103_v3  ;;  %2076 = vmatprep.subr.mxu1 %v2741_v0  ;;  %v2819_v14 = vld [vmem:[#allocation8 + $0x48] sm:$0xff]  ;;  %v2823_v16 = vld [vmem:[#allocation8 + $0x40] sm:$0xff]  ;;  %v96_v17 = vld [vmem:[#allocation6 + $0x38] sm:$0xff] }
  0x37   :  { %2020 = vmatprep.subr.mxu0 %v102_v5  ;;  %2077 = vmatpush3.msra.mxu1 %v2803_v6  ;;  %v2827_v18 = vld [vmem:[#allocation8 + $0x38] sm:$0xff]  ;;  %v95_v19 = vld [vmem:[#allocation6 + $0x30] sm:$0xff]  ;;  %v94_v21 = vld [vmem:[#allocation6 + $0x28] sm:$0xff]  ;;  %p2714_p9 = por %p2713_p8, %p2712_p7 }
  0x38   :  { %2021 = vmatpush3.msra.mxu0 %v102_v5  ;;  %2078 = vmatprep.subr.mxu1 %v2741_v0  ;;  %v2831_v20 = vld [vmem:[#allocation8 + $0x30] sm:$0xff]  ;;  %v2835_v22 = vld [vmem:[#allocation8 + $0x28] sm:$0xff]  ;;  %v93_v23 = vld [vmem:[#allocation6 + $0x20] sm:$0xff] }
  0x39   :  { %2022 = vmatprep.subr.mxu0 %v101_v7  ;;  %2079 = vmatpush3.msra.mxu1 %v2807_v8  ;;  %v2839_v24 = vld [vmem:[#allocation8 + $0x20] sm:$0xff]  ;;  %v92_v25 = vld [vmem:[#allocation6 + $0x18] sm:$0xff]  ;;  %v91_v27 = vld [vmem:[#allocation6 + $0x10] sm:$0xff]  ;;  %p2715_p10 = pnand %p2714_p9, %p2708_p6 }
  0x3a   :  { %2023 = vmatpush3.msra.mxu0 %v101_v7  ;;  %2080 = vmatprep.subr.mxu1 %v2741_v0  ;;  %v2843_v26 = vld [vmem:[#allocation8 + $0x18] sm:$0xff]  ;;  %v2847_v28 = vld [vmem:[#allocation8 + $0x10] sm:$0xff]  ;;  %v90_v29 = vld [vmem:[#allocation6 + $0x8] sm:$0xff] }
  0x3b   :  { %2024 = vmatprep.subr.mxu0 %v100_v9  ;;  %2081 = vmatpush3.msra.mxu1 %v2811_v10  ;;  %v2851_v30 = vld [vmem:[#allocation8 + $0x8] sm:$0xff]  ;;  %v89_v31 = vld [vmem:[#allocation6] sm:$0xff]  ;;  %v75_v35 = vld [vmem:[#allocation3 + $0x10] sm:$0xff] }
  0x3c   :  { %2025 = vmatpush3.msra.mxu0 %v100_v9  ;;  %2082 = vmatprep.subr.mxu1 %v2741_v0  ;;  %v2855_v32 = vld [vmem:[#allocation8] sm:$0xff]  ;;  %v74_v34 = vld [vmem:[#allocation3 + $0x8] sm:$0xff]  ;;  %v76_v36 = vld [vmem:[#allocation3 + $0x18] sm:$0xff] }
  0x3d   :  { %2026 = vmatprep.subr.mxu0 %v99_v11  ;;  %2083 = vmatpush3.msra.mxu1 %v2815_v12  ;;  %v73_v33 = vld [vmem:[#allocation3] sm:$0xff]  ;;  %v78_v38 = vld [vmem:[#allocation3 + $0x28] sm:$0xff]  ;;  %v79_v39 = vld [vmem:[#allocation3 + $0x30] sm:$0xff] }
  0x3e   :  { %2027 = vmatpush3.msra.mxu0 %v99_v11  ;;  %2084 = vmatprep.subr.mxu1 %v2741_v0  ;;  %v77_v37 = vld [vmem:[#allocation3 + $0x20] sm:$0xff]  ;;  %v80_v40 = vld [vmem:[#allocation3 + $0x38] sm:$0xff]  ;;  %v82_v42 = vld [vmem:[#allocation3 + $0x48] sm:$0xff] }
  0x3f   :  { %2028 = vmatprep.subr.mxu0 %v98_v13  ;;  %2085 = vmatpush3.msra.mxu1 %v2819_v14  ;;  %v81_v41 = vld [vmem:[#allocation3 + $0x40] sm:$0xff]  ;;  %v83_v43 = vld [vmem:[#allocation3 + $0x50] sm:$0xff]  ;;  %v84_v44 = vld [vmem:[#allocation3 + $0x58] sm:$0xff] }
  0x40   :  { %2029 = vmatpush3.msra.mxu0 %v98_v13  ;;  %2086 = vmatprep.subr.mxu1 %v2741_v0  ;;  %v85_v45 = vld [vmem:[#allocation3 + $0x60] sm:$0xff]  ;;  %v86_v46 = vld [vmem:[#allocation3 + $0x68] sm:$0xff]  ;;  %v87_v47 = vld [vmem:[#allocation3 + $0x70] sm:$0xff] }
  0x41   :  { %2030 = vmatprep.subr.mxu0 %v97_v15  ;;  %2087 = vmatpush3.msra.mxu1 %v2823_v16  ;;  %v88_v48 = vld [vmem:[#allocation3 + $0x78] sm:$0xff] }
  0x42   :  { %2031 = vmatpush3.msra.mxu0 %v97_v15  ;;  %2088 = vmatprep.subr.mxu1 %v2741_v0 }
  0x43   :  { %2032 = vmatprep.subr.mxu0 %v96_v17  ;;  %2089 = vmatpush3.msra.mxu1 %v2827_v18 }
  0x44   :  { %2033 = vmatpush3.msra.mxu0 %v96_v17  ;;  %2090 = vmatprep.subr.mxu1 %v2741_v0 }
  0x45   :  { %2034 = vmatprep.subr.mxu0 %v95_v19  ;;  %2091 = vmatpush3.msra.mxu1 %v2831_v20 }
  0x46   :  { %2035 = vmatpush3.msra.mxu0 %v95_v19  ;;  %2092 = vmatprep.subr.mxu1 %v2741_v0 }
  0x47   :  { %2036 = vmatprep.subr.mxu0 %v94_v21  ;;  %2093 = vmatpush3.msra.mxu1 %v2835_v22 }
  0x48   :  { %2037 = vmatpush3.msra.mxu0 %v94_v21  ;;  %2094 = vmatprep.subr.mxu1 %v2741_v0 }
  0x49   :  { %2038 = vmatprep.subr.mxu0 %v93_v23  ;;  %2095 = vmatpush3.msra.mxu1 %v2839_v24 }
  0x4a   :  { %2039 = vmatpush3.msra.mxu0 %v93_v23  ;;  %2096 = vmatprep.subr.mxu1 %v2741_v0 }
  0x4b   :  { %2040 = vmatprep.subr.mxu0 %v92_v25  ;;  %2097 = vmatpush3.msra.mxu1 %v2843_v26 }
  0x4c   :  { %2041 = vmatpush3.msra.mxu0 %v92_v25  ;;  %2098 = vmatprep.subr.mxu1 %v2741_v0 }
  0x4d   :  { %2042 = vmatprep.subr.mxu0 %v91_v27  ;;  %2099 = vmatpush3.msra.mxu1 %v2847_v28 }
  0x4e   :  { %2043 = vmatpush3.msra.mxu0 %v91_v27  ;;  %2100 = vmatprep.subr.mxu1 %v2741_v0 }
  0x4f   :  { %2044 = vmatprep.subr.mxu0 %v90_v29  ;;  %2101 = vmatpush3.msra.mxu1 %v2851_v30 }
  0x50   :  { %2045 = vmatpush3.msra.mxu0 %v90_v29  ;;  %2102 = vmatprep.subr.mxu1 %v2741_v0  ;;  %v2743_v29 = vmov -1.0  }
  0x51   :  { %2046 = vmatprep.subr.mxu0 %v89_v31  ;;  %2103 = vmatpush3.msra.mxu1 %v2855_v32 }
  0x52   :  { %2047 = vmatpush3.msra.mxu0 %v89_v31  ;;  %2048 = vmatprep.mubr.f32.mxu0 %v73_v33 }
  0x53   :  { %2142 = vmatprep.subr.mxu1 %v2741_v0  ;;  %2049 = vmatmul.mubr.f32.vlgmr.msra.gmra.mxu0 %v74_v34 }
  0x54   :  { %2105 = vmatmul.mubr.f32.vlgmr.msra.gmra.mxu1 %v2741_v0  ;;  %2107 = vmatprep.subr.mxu0 %v2741_v0 }
  0x55   :  { %2143 = vmatpush3.msra.mxu1 %v2797_v2  ;;  %2108 = vmatpush3.msra.mxu0 %v2797_v2 }
  0x56   :  { %2144 = vmatprep.subr.mxu1 %v2741_v0  ;;  %2109 = vmatprep.subr.mxu0 %v2741_v0 }
  0x57   :  { %2145 = vmatpush3.msra.mxu1 %v2800_v4  ;;  %2051 = vmatprep.mubr.f32.mxu0 %v75_v35 }
  0x58   :  { %2110 = vmatpush3.msra.mxu0 %v2800_v4  ;;  %2146 = vmatprep.subr.mxu1 %v2741_v0 }
  0x59   :  { %2052 = vmatmul.mubr.f32.gmra.mxu0 %v76_v36  ;;  %2111 = vmatprep.subr.mxu0 %v2741_v0 }
  0x5a   :  { %2147 = vmatpush3.msra.mxu1 %v2803_v6  ;;  %2112 = vmatpush3.msra.mxu0 %v2803_v6 }
  0x5b   :  { %2148 = vmatprep.subr.mxu1 %v2741_v0  ;;  %2113 = vmatprep.subr.mxu0 %v2741_v0 }
  0x5c   :  { %2149 = vmatpush3.msra.mxu1 %v2807_v8  ;;  %2054 = vmatprep.mubr.f32.mxu0 %v77_v37 }
  0x5d   :  { %2114 = vmatpush3.msra.mxu0 %v2807_v8  ;;  %2150 = vmatprep.subr.mxu1 %v2741_v0 }
  0x5e   :  { %2055 = vmatmul.mubr.f32.gmra.mxu0 %v78_v38  ;;  %2115 = vmatprep.subr.mxu0 %v2741_v0 }
  0x5f   :  { %2151 = vmatpush3.msra.mxu1 %v2811_v10  ;;  %2116 = vmatpush3.msra.mxu0 %v2811_v10 }
  0x60   :  { %2152 = vmatprep.subr.mxu1 %v2741_v0  ;;  %2117 = vmatprep.subr.mxu0 %v2741_v0 }
  0x61   :  { %2153 = vmatpush3.msra.mxu1 %v2815_v12  ;;  %2057 = vmatprep.mubr.f32.mxu0 %v79_v39 }
  0x62   :  { %2118 = vmatpush3.msra.mxu0 %v2815_v12  ;;  %2154 = vmatprep.subr.mxu1 %v2741_v0 }
  0x63   :  { %2058 = vmatmul.mubr.f32.gmra.mxu0 %v80_v40  ;;  %2119 = vmatprep.subr.mxu0 %v2741_v0 }
  0x64   :  { %2155 = vmatpush3.msra.mxu1 %v2819_v14  ;;  %2120 = vmatpush3.msra.mxu0 %v2819_v14 }
  0x65   :  { %2156 = vmatprep.subr.mxu1 %v2741_v0  ;;  %2121 = vmatprep.subr.mxu0 %v2741_v0 }
  0x66   :  { %2157 = vmatpush3.msra.mxu1 %v2823_v16  ;;  %2060 = vmatprep.mubr.f32.mxu0 %v81_v41 }
  0x67   :  { %2122 = vmatpush3.msra.mxu0 %v2823_v16  ;;  %2158 = vmatprep.subr.mxu1 %v2741_v0 }
  0x68   :  { %2061 = vmatmul.mubr.f32.gmra.mxu0 %v82_v42  ;;  %2123 = vmatprep.subr.mxu0 %v2741_v0 }
  0x69   :  { %2159 = vmatpush3.msra.mxu1 %v2827_v18  ;;  %2124 = vmatpush3.msra.mxu0 %v2827_v18 }
  0x6a   :  { %2160 = vmatprep.subr.mxu1 %v2741_v0  ;;  %2125 = vmatprep.subr.mxu0 %v2741_v0 }
  0x6b   :  { %2161 = vmatpush3.msra.mxu1 %v2831_v20  ;;  %2063 = vmatprep.mubr.f32.mxu0 %v83_v43 }
  0x6c   :  { %2126 = vmatpush3.msra.mxu0 %v2831_v20  ;;  %2162 = vmatprep.subr.mxu1 %v2741_v0 }
  0x6d   :  { %2064 = vmatmul.mubr.f32.gmra.mxu0 %v84_v44  ;;  %2127 = vmatprep.subr.mxu0 %v2741_v0 }
  0x6e   :  { %2163 = vmatpush3.msra.mxu1 %v2835_v22  ;;  %2128 = vmatpush3.msra.mxu0 %v2835_v22 }
  0x6f   :  { %2164 = vmatprep.subr.mxu1 %v2741_v0  ;;  %2129 = vmatprep.subr.mxu0 %v2741_v0 }
  0x70   :  { %2165 = vmatpush3.msra.mxu1 %v2839_v24  ;;  %2066 = vmatprep.mubr.f32.mxu0 %v85_v45 }
  0x71   :  { %2130 = vmatpush3.msra.mxu0 %v2839_v24  ;;  %2166 = vmatprep.subr.mxu1 %v2741_v0 }
  0x72   :  { %2067 = vmatmul.mubr.f32.gmra.mxu0 %v86_v46  ;;  %2131 = vmatprep.subr.mxu0 %v2741_v0 }
  0x73   :  { %2167 = vmatpush3.msra.mxu1 %v2843_v26  ;;  %2132 = vmatpush3.msra.mxu0 %v2843_v26 }
  0x74   :  { %2168 = vmatprep.subr.mxu1 %v2741_v0  ;;  %2133 = vmatprep.subr.mxu0 %v2741_v0 }
  0x75   :  { %2169 = vmatpush3.msra.mxu1 %v2847_v28  ;;  %2069 = vmatprep.mubr.f32.mxu0 %v87_v47 }
  0x76   :  { %2134 = vmatpush3.msra.mxu0 %v2847_v28  ;;  %2170 = vmatprep.subr.mxu1 %v2741_v0 }
  0x77   :  { %2070 = vmatmul.mubr.f32.gmra.mxu0 %v88_v48  ;;  %2135 = vmatprep.subr.mxu0 %v2741_v0 }
  0x78   :  { %2171 = vmatpush3.msra.mxu1 %v2851_v30  ;;  %2136 = vmatpush3.msra.mxu0 %v2851_v30 }
  0x79   :  { %2172 = vmatprep.subr.mxu1 %v2741_v0  ;;  %2137 = vmatprep.subr.mxu0 %v2741_v0 }
  0x7a   :  { %2173 = vmatpush3.msra.mxu1 %v2855_v32  ;;  %2174 = vmatprep.mubr.msk.f32.mxu1 %vm2742_vm0, %v2741_v0 }
  0x7b   :  { %2138 = vmatpush3.msra.mxu0 %v2855_v32  ;;  %2139 = vmatprep.mubr.msk.f32.mxu0 %vm2742_vm0, %v2741_v0 }
  0x7c   :  { %2175 = vmatmul.mubr.f32.vlgmr.msra.gmra.mxu1 %v2741_v0  ;;  %2140 = vmatmul.mubr.f32.vlgmr.msra.gmra.mxu0 %v2741_v0 }
  0x7d   :  { %2177 = vmatprep.subr.mxu0 %v2741_v0  ;;  %2212 = vmatprep.subr.mxu1 %v2741_v0 }
  0x7e   :  { %2178 = vmatpush3.msra.mxu0 %v2797_v2  ;;  %2213 = vmatpush3.msra.mxu1 %v2797_v2 }
  0x7f   :  { %2179 = vmatprep.subr.mxu0 %v2741_v0  ;;  %2214 = vmatprep.subr.mxu1 %v2741_v0 }
  0x80   :  { %2180 = vmatpush3.msra.mxu0 %v2800_v4  ;;  %2215 = vmatpush3.msra.mxu1 %v2800_v4 }
  0x81   :  { %2181 = vmatprep.subr.mxu0 %v2741_v0  ;;  %2216 = vmatprep.subr.mxu1 %v2741_v0 }
  0x82   :  { %2182 = vmatpush3.msra.mxu0 %v2803_v6  ;;  %2217 = vmatpush3.msra.mxu1 %v2803_v6 }
  0x83   :  { %2183 = vmatprep.subr.mxu0 %v2741_v0  ;;  %2218 = vmatprep.subr.mxu1 %v2741_v0 }
  0x84   :  { %2184 = vmatpush3.msra.mxu0 %v2807_v8  ;;  %2219 = vmatpush3.msra.mxu1 %v2807_v8 }
  0x85   :  { %2185 = vmatprep.subr.mxu0 %v2741_v0  ;;  %2220 = vmatprep.subr.mxu1 %v2741_v0 }
  0x86   :  { %2186 = vmatpush3.msra.mxu0 %v2811_v10  ;;  %2221 = vmatpush3.msra.mxu1 %v2811_v10 }
  0x87   :  { %2187 = vmatprep.subr.mxu0 %v2741_v0  ;;  %2222 = vmatprep.subr.mxu1 %v2741_v0 }
  0x88   :  { %2188 = vmatpush3.msra.mxu0 %v2815_v12  ;;  %2223 = vmatpush3.msra.mxu1 %v2815_v12 }
  0x89   :  { %2189 = vmatprep.subr.mxu0 %v2741_v0  ;;  %2224 = vmatprep.subr.mxu1 %v2741_v0 }
  0x8a   :  { %2190 = vmatpush3.msra.mxu0 %v2819_v14  ;;  %2225 = vmatpush3.msra.mxu1 %v2819_v14 }
  0x8b   :  { %2191 = vmatprep.subr.mxu0 %v2741_v0  ;;  %2226 = vmatprep.subr.mxu1 %v2741_v0 }
  0x8c   :  { %2192 = vmatpush3.msra.mxu0 %v2823_v16  ;;  %2227 = vmatpush3.msra.mxu1 %v2823_v16 }
  0x8d   :  { %2193 = vmatprep.subr.mxu0 %v2741_v0  ;;  %2209 = vmatprep.mubr.msk.f32.mxu0 %vm2742_vm0, %v2741_v0 }
  0x8e   :  { %2194 = vmatpush3.msra.mxu0 %v2827_v18  ;;  %2228 = vmatprep.subr.mxu1 %v2741_v0 }
  0x8f   :  { %2195 = vmatprep.subr.mxu0 %v2741_v0  ;;  %2229 = vmatpush3.msra.mxu1 %v2827_v18 }
  0x90   :  { %2196 = vmatpush3.msra.mxu0 %v2831_v20  ;;  %2230 = vmatprep.subr.mxu1 %v2741_v0 }
  0x91   :  { %2197 = vmatprep.subr.mxu0 %v2741_v0  ;;  %2231 = vmatpush3.msra.mxu1 %v2831_v20 }
  0x92   :  { %2198 = vmatpush3.msra.mxu0 %v2835_v22  ;;  %2232 = vmatprep.subr.mxu1 %v2741_v0 }
  0x93   :  { %2199 = vmatprep.subr.mxu0 %v2741_v0  ;;  %2233 = vmatpush3.msra.mxu1 %v2835_v22 }
  0x94   :  { %2200 = vmatpush3.msra.mxu0 %v2839_v24  ;;  %2234 = vmatprep.subr.mxu1 %v2741_v0 }
  0x95   :  { %2201 = vmatprep.subr.mxu0 %v2741_v0  ;;  %2235 = vmatpush3.msra.mxu1 %v2839_v24 }
  0x96   :  { %2202 = vmatpush3.msra.mxu0 %v2843_v26  ;;  %2236 = vmatprep.subr.mxu1 %v2741_v0 }
  0x97   :  { %2203 = vmatprep.subr.mxu0 %v2741_v0  ;;  %2237 = vmatpush3.msra.mxu1 %v2843_v26 }
  0x98   :  { %2204 = vmatpush3.msra.mxu0 %v2847_v28  ;;  %2238 = vmatprep.subr.mxu1 %v2741_v0 }
  0x99   :  { %2205 = vmatprep.subr.mxu0 %v2741_v0  ;;  %2239 = vmatpush3.msra.mxu1 %v2847_v28 }
  0x9a   :  { %2206 = vmatpush3.msra.mxu0 %v2851_v30  ;;  %2240 = vmatprep.subr.mxu1 %v2741_v0 }
  0x9b   :  { %2207 = vmatprep.subr.mxu0 %v2741_v0  ;;  %2241 = vmatpush3.msra.mxu1 %v2851_v30 }
  0x9c   :  { %2208 = vmatpush3.msra.mxu0 %v2855_v32  ;;  %2242 = vmatprep.subr.mxu1 %v2741_v0 }
  0x9d   :  { %2243 = vmatpush3.msra.mxu1 %v2855_v32  ;;  %2244 = vmatprep.mubr.msk.f32.mxu1 %vm2742_vm0, %v2741_v0 }
  0x9e   :  { %2247 = vmatprep.subr.mxu0 %v2741_v0  ;;  %2282 = vmatprep.subr.mxu1 %v2741_v0 }
 0x113   :  { %v2050_v49 = vpop.f32.mrf.mxu0 }
 0x114   :  { %v349_v50 = vpop.f32.mrf.mxu1 }
 0x115   :  { %v171_v51 = vpop.f32.mrf.mxu0 }
 0x116   :  { %v2106_v52 = vpop.f32.mrf.mxu1 }
 0x119   :  { %v2053_v53 = vpop.f32.mrf.mxu0 }
 0x11b   :  { %v181_v54 = vpop.f32.mrf.mxu0 }
 0x11e   :  { %v3001_v55 = vpop.f32.mrf.mxu0 }
 0x120   :  { %v3003_v56 = vpop.f32.mrf.mxu0 }
 0x123   :  { %v3005_v57 = vpop.f32.mrf.mxu0 }
 0x125   :  { %v3007_v58 = vpop.f32.mrf.mxu0 }
 0x128   :  { %v3009_v59 = vpop.f32.mrf.mxu0 }
 0x12a   :  { %v3011_v60 = vpop.f32.mrf.mxu0 }
 0x12d   :  { %v3013_v61 = vpop.f32.mrf.mxu0 }
 0x12f   :  { %v3015_v62 = vpop.f32.mrf.mxu0 }
 0x132   :  { %v3017_v63 = vpop.f32.mrf.mxu0 }
 0x134   :  { %v3019_v1 = vpop.f32.mrf.mxu0 }
 0x137   :  { %v2071_v3 = vpop.f32.mrf.mxu0 }
 0x139   :  { %v3021_v5 = vpop.f32.mrf.mxu0 }
 0x13c   :  { %v545_v7 = vpop.f32.mrf.mxu1  ;;  %v453_v9 = vpop.f32.mrf.mxu0 }
 0x13d   :  { %v457_v11 = vadd.f32 %v453_v9, %v181_v54  ;;  %v549_v21 = vadd.f32 %v2053_v53, %v545_v7 }
 0x13e   :  { %v2141_v13 = vpop.f32.mrf.mxu0  ;;  %v2176_v15 = vpop.f32.mrf.mxu1 }
 0x13f   :  { %v463_v17 = vmul.f32 0.095162585, %v457_v11  ;;  %v555_v33 = vmul.f32 0.095162585, %v549_v21 }
 0x141   :  { %v1703_v19 = vadd.f32 -0.5, %v463_v17  ;;  %v554_v25 = vmul.f32 0.9048374, %v463_v17 }
 0x143   :  { %vm472_vm1 = vcmp.gt.f32.partialorder %v1703_v19, 0.0  ;;  %v556_v35 = vadd.f32 %v555_v33, %v554_v25 }
 0x144   :  { %v1704_v23 = vsel %vm472_vm1, 1.0, %v2741_v0 }
 0x145   :  { %vm475_vm2 = vcmp.gt.f32.partialorder %v1704_v23, 0.0  ;;  %v559_v27 = vmul.f32 0.016666668, %v1704_v23  ;;  %vm552_vm4 = vcmp.eq.f32.partialorder %v1704_v23, 0.0 }
 0x146   :  { %v476_v31 = vsel %vm475_vm2, 2.0, %v2743_v29 }
 0x147   :  { %v550_v34 = vadd.f32 2.0, %v476_v31  ;;  %2210 = vmatmul.mubr.f32.vlgmr.msra.gmra.mxu0 %v559_v27  ;;  %v650_v39 = vmul.f32 0.60653067, %v559_v27  ;;  %v653_v43 = vmul.f32 0.9672161, %v559_v27  ;;  %v569_v45 = vmax.f32 %v559_v27, 0.0 }
 0x148   :  { %2248 = vmatpush3.msra.mxu0 %v2797_v2  ;;  %2279 = vmatprep.mubr.msk.f32.mxu0 %vm2742_vm0, %v2741_v0 }
 0x149   :  { %vm551_vm3 = vcmp.lt.f32.partialorder %v550_v34, 3.0  ;;  %2249 = vmatprep.subr.mxu0 %v2741_v0 }
 0x14a   :  { %vm553_vm5 = vmand %vm551_vm3, %vm552_vm4  ;;  %2250 = vmatpush3.msra.mxu0 %v2800_v4 }
 0x14b   :  { %v3029_v36 = vsel %vm553_vm5, %v556_v35, 0.0  ;;  %2251 = vmatprep.subr.mxu0 %v2741_v0 }
 0x14c   :  { %v1705_v37 = vadd.f32 -0.5, %v3029_v36  ;;  %2252 = vmatpush3.msra.mxu0 %v2803_v6  ;;  %v646_v52 = vmul.f32 0.9048374, %v3029_v36 }
 0x14d   :  { %2253 = vmatprep.subr.mxu0 %v2741_v0 }
 0x14e   :  { %vm564_vm6 = vcmp.gt.f32.partialorder %v1705_v37, 0.0  ;;  %2254 = vmatpush3.msra.mxu0 %v2807_v8 }
 0x14f   :  { %v1706_v38 = vsel %vm564_vm6, 1.0, %v2741_v0  ;;  %2255 = vmatprep.subr.mxu0 %v2741_v0 }
 0x150   :  { %v651_v40 = vmul.f32 0.016666668, %v1706_v38  ;;  %2256 = vmatpush3.msra.mxu0 %v2811_v10  ;;  %vm567_vm7 = vcmp.gt.f32.partialorder %v1706_v38, 0.0  ;;  %vm644_vm9 = vcmp.eq.f32.partialorder %v1706_v38, 0.0 }
 0x151   :  { %2257 = vmatprep.subr.mxu0 %v2741_v0  ;;  %v3040_v41 = vsel %vm567_vm7, 3.0, %v476_v31 }
 0x152   :  { %v3042_v42 = vadd.f32 %v651_v40, %v650_v39  ;;  %2258 = vmatpush3.msra.mxu0 %v2815_v12  ;;  %v642_v44 = vadd.f32 2.0, %v3040_v41 }
 0x153   :  { %2259 = vmatprep.subr.mxu0 %v2741_v0 }
 0x154   :  { %v3048_v46 = vadd.f32 %v653_v43, %v3042_v42  ;;  %2260 = vmatpush3.msra.mxu0 %v2819_v14  ;;  %vm643_vm8 = vcmp.lt.f32.partialorder %v642_v44, 4.0  ;;  %v742_v13 = vmul.f32 0.60653067, %v3042_v42 }
 0x155   :  { %vm3051_vm10 = vmand %vm643_vm8, %vm644_vm9  ;;  %2261 = vmatprep.subr.mxu0 %v2741_v0 }
 0x156   :  { %v3057_v48 = vmax.f32 %v569_v45, %v3048_v46  ;;  %2245 = vmatmul.mubr.f32.vlgmr.msra.gmra.mxu1 %v3048_v46  ;;  %2262 = vmatpush3.msra.mxu0 %v2823_v16  ;;  %v745_v19 = vmul.f32 0.9672161, %v3048_v46 }
 0x157   :  { %2263 = vmatprep.subr.mxu0 %v2741_v0  ;;  %2283 = vmatpush3.msra.mxu1 %v2797_v2 }
 0x158   :  { %2264 = vmatpush3.msra.mxu0 %v2827_v18  ;;  %2284 = vmatprep.subr.mxu1 %v2741_v0 }
 0x159   :  { %2265 = vmatprep.subr.mxu0 %v2741_v0  ;;  %2285 = vmatpush3.msra.mxu1 %v2800_v4 }
 0x15a   :  { %2266 = vmatpush3.msra.mxu0 %v2831_v20  ;;  %2286 = vmatprep.subr.mxu1 %v2741_v0 }
 0x15b   :  { %2267 = vmatprep.subr.mxu0 %v2741_v0  ;;  %2287 = vmatpush3.msra.mxu1 %v2803_v6 }
 0x15c   :  { %2268 = vmatpush3.msra.mxu0 %v2835_v22  ;;  %2288 = vmatprep.subr.mxu1 %v2741_v0 }
 0x15d   :  { %2269 = vmatprep.subr.mxu0 %v2741_v0  ;;  %2289 = vmatpush3.msra.mxu1 %v2807_v8 }
 0x15e   :  { %2270 = vmatpush3.msra.mxu0 %v2839_v24  ;;  %2290 = vmatprep.subr.mxu1 %v2741_v0 }
 0x15f   :  { %2271 = vmatprep.subr.mxu0 %v2741_v0  ;;  %2291 = vmatpush3.msra.mxu1 %v2811_v10 }
 0x160   :  { %2272 = vmatpush3.msra.mxu0 %v2843_v26  ;;  %2292 = vmatprep.subr.mxu1 %v2741_v0 }
 0x161   :  { %2273 = vmatprep.subr.mxu0 %v2741_v0  ;;  %2293 = vmatpush3.msra.mxu1 %v2815_v12 }
 0x162   :  { %2274 = vmatpush3.msra.mxu0 %v2847_v28  ;;  %2294 = vmatprep.subr.mxu1 %v2741_v0 }
 0x163   :  { %2275 = vmatprep.subr.mxu0 %v2741_v0  ;;  %2295 = vmatpush3.msra.mxu1 %v2819_v14 }
 0x164   :  { %2276 = vmatpush3.msra.mxu0 %v2851_v30  ;;  %2296 = vmatprep.subr.mxu1 %v2741_v0 }
 0x165   :  { %2277 = vmatprep.subr.mxu0 %v2741_v0  ;;  %2297 = vmatpush3.msra.mxu1 %v2823_v16 }
 0x166   :  { %2278 = vmatpush3.msra.mxu0 %v2855_v32  ;;  %2298 = vmatprep.subr.mxu1 %v2741_v0 }
 0x167   :  { %2299 = vmatpush3.msra.mxu1 %v2827_v18  ;;  %2314 = vmatprep.mubr.msk.f32.mxu1 %vm2742_vm0, %v2741_v0 }
 0x168   :  { %2300 = vmatprep.subr.mxu1 %v2741_v0  ;;  %2317 = vmatprep.subr.mxu0 %v2741_v0 }
 0x169   :  { %2301 = vmatpush3.msra.mxu1 %v2831_v20 }
 0x16a   :  { %2302 = vmatprep.subr.mxu1 %v2741_v0 }
 0x16b   :  { %2303 = vmatpush3.msra.mxu1 %v2835_v22 }
 0x16c   :  { %2304 = vmatprep.subr.mxu1 %v2741_v0 }
 0x16d   :  { %2305 = vmatpush3.msra.mxu1 %v2839_v24 }
 0x16e   :  { %2306 = vmatprep.subr.mxu1 %v2741_v0 }
 0x16f   :  { %2307 = vmatpush3.msra.mxu1 %v2843_v26 }
 0x170   :  { %2308 = vmatprep.subr.mxu1 %v2741_v0 }
 0x171   :  { %2309 = vmatpush3.msra.mxu1 %v2847_v28 }
 0x172   :  { %2310 = vmatprep.subr.mxu1 %v2741_v0 }
 0x173   :  { %2311 = vmatpush3.msra.mxu1 %v2851_v30 }
 0x174   :  { %2312 = vmatprep.subr.mxu1 %v2741_v0 }
 0x175   :  { %2313 = vmatpush3.msra.mxu1 %v2855_v32 }
 0x176   :  { %2352 = vmatprep.subr.mxu1 %v2741_v0 }
 0x207   :  { %v637_v49 = vpop.f32.mrf.mxu0 }
 0x208   :  { %v641_v50 = vadd.f32 %v637_v49, %v3003_v56 }
 0x209   :  { %v2211_v51 = vpop.f32.mrf.mxu0 }
 0x20a   :  { %v647_v53 = vmul.f32 0.095162585, %v641_v50 }
 0x20c   :  { %v648_v54 = vadd.f32 %v647_v53, %v646_v52 }
 0x20e   :  { %v649_v3 = vsel %vm3051_vm10, %v648_v54, 0.0 }
 0x20f   :  { %v1707_v7 = vadd.f32 -0.5, %v649_v3  ;;  %v738_v29 = vmul.f32 0.9048374, %v649_v3  ;;  %v3220_v3 = vld [vmem:[#allocation8 + $0x78] sm:$0xff] }
 0x211   :  { %vm656_vm11 = vcmp.gt.f32.partialorder %v1707_v7, 0.0 }
 0x212   :  { %v1708_v9 = vsel %vm656_vm11, 1.0, %v2741_v0 }
 0x213   :  { %v743_v11 = vmul.f32 0.016666668, %v1708_v9  ;;  %vm659_vm12 = vcmp.gt.f32.partialorder %v1708_v9, 0.0  ;;  %vm736_vm14 = vcmp.eq.f32.partialorder %v1708_v9, 0.0 }
 0x214   :  { %v660_v15 = vsel %vm659_vm12, 4.0, %v3040_v41 }
 0x215   :  { %v734_v17 = vadd.f32 2.0, %v660_v15  ;;  %v744_v56 = vadd.f32 %v743_v11, %v742_v13  ;;  %v3233_v13 = vld [vmem:[#allocation8 + $0x68] sm:$0xff] }
 0x216   :  { %v729_v21 = vpop.f32.mrf.mxu1 }
 0x217   :  { %v733_v23 = vadd.f32 %v3001_v55, %v729_v21  ;;  %vm735_vm13 = vcmp.lt.f32.partialorder %v734_v17, 5.0  ;;  %v746_v25 = vadd.f32 %v745_v19, %v744_v56  ;;  %v834_v38 = vmul.f32 0.60653067, %v744_v56  ;;  %v3242_v21 = vld [vmem:[#allocation8 + $0x58] sm:$0xff] }
 0x218   :  { %vm737_vm15 = vmand %vm735_vm13, %vm736_vm14  ;;  %v2246_v27 = vpop.f32.mrf.mxu1 }
 0x219   :  { %v739_v31 = vmul.f32 0.095162585, %v733_v23  ;;  %v753_v33 = vmax.f32 %v3057_v48, %v746_v25  ;;  %2280 = vmatmul.mubr.f32.vlgmr.msra.gmra.mxu0 %v746_v25  ;;  %v837_v41 = vmul.f32 0.9672161, %v746_v25 }
 0x21a   :  { %2318 = vmatpush3.msra.mxu0 %v2797_v2  ;;  %2349 = vmatprep.mubr.msk.f32.mxu0 %vm2742_vm0, %v2741_v0 }
 0x21b   :  { %v740_v34 = vadd.f32 %v739_v31, %v738_v29  ;;  %2319 = vmatprep.subr.mxu0 %v2741_v0  ;;  %v3250_v29 = vld [vmem:[#allocation8 + $0x50] sm:$0xff] }
 0x21c   :  { %2320 = vmatpush3.msra.mxu0 %v2800_v4 }
 0x21d   :  { %v3127_v55 = vsel %vm737_vm15, %v740_v34, 0.0  ;;  %2321 = vmatprep.subr.mxu0 %v2741_v0  ;;  %v3258_v34 = vld [vmem:[#allocation8 + $0x48] sm:$0xff] }
 0x21e   :  { %v1709_v35 = vadd.f32 -0.5, %v3127_v55  ;;  %2322 = vmatpush3.msra.mxu0 %v2803_v6 }
 0x21f   :  { %2323 = vmatprep.subr.mxu0 %v2741_v0 }
 0x220   :  { %vm748_vm1 = vcmp.gt.f32.partialorder %v1709_v35, 0.0  ;;  %2324 = vmatpush3.msra.mxu0 %v2807_v8 }
 0x221   :  { %v1710_v36 = vsel %vm748_vm1, 1.0, %v2741_v0  ;;  %2325 = vmatprep.subr.mxu0 %v2741_v0 }
 0x222   :  { %v835_v37 = vmul.f32 0.016666668, %v1710_v36  ;;  %2326 = vmatpush3.msra.mxu0 %v2811_v10  ;;  %vm751_vm2 = vcmp.gt.f32.partialorder %v1710_v36, 0.0  ;;  %vm828_vm4 = vcmp.eq.f32.partialorder %v1710_v36, 0.0  ;;  %v3270_v36 = vld [vmem:[#allocation8 + $0x40] sm:$0xff] }
 0x223   :  { %2327 = vmatprep.subr.mxu0 %v2741_v0  ;;  %v3138_v39 = vsel %vm751_vm2, 5.0, %v660_v15  ;;  %v3237_v15 = vld [vmem:[#allocation8 + $0x60] sm:$0xff] }
 0x224   :  { %v3140_v40 = vadd.f32 %v835_v37, %v834_v38  ;;  %2328 = vmatpush3.msra.mxu0 %v2815_v12  ;;  %v826_v42 = vadd.f32 2.0, %v3138_v39  ;;  %v3275_v37 = vld [vmem:[#allocation8 + $0x38] sm:$0xff]  ;;  %v3281_v38 = vld [vmem:[#allocation8 + $0x30] sm:$0xff] }
 0x225   :  { %2329 = vmatprep.subr.mxu0 %v2741_v0 }
 0x226   :  { %v3146_v43 = vadd.f32 %v837_v41, %v3140_v40  ;;  %2330 = vmatpush3.msra.mxu0 %v2819_v14  ;;  %vm827_vm3 = vcmp.lt.f32.partialorder %v826_v42, 6.0 }
 0x227   :  { %vm3149_vm5 = vmand %vm827_vm3, %vm828_vm4  ;;  %2331 = vmatprep.subr.mxu0 %v2741_v0 }
 0x228   :  { %v3155_v45 = vmax.f32 %v753_v33, %v3146_v43  ;;  %2315 = vmatmul.mubr.f32.vlgmr.msra.gmra.mxu1 %v3146_v43  ;;  %2332 = vmatpush3.msra.mxu0 %v2823_v16  ;;  %v929_v47 = vmul.f32 0.9672161, %v3146_v43 }
 0x229   :  { %2333 = vmatprep.subr.mxu0 %v2741_v0  ;;  %2353 = vmatpush3.msra.mxu1 %v2797_v2 }
 0x22a   :  { %2334 = vmatpush3.msra.mxu0 %v2827_v18  ;;  %2354 = vmatprep.subr.mxu1 %v2741_v0 }
 0x22b   :  { %2335 = vmatprep.subr.mxu0 %v2741_v0  ;;  %2355 = vmatpush3.msra.mxu1 %v2800_v4 }
 0x22c   :  { %2336 = vmatpush3.msra.mxu0 %v2831_v20  ;;  %2356 = vmatprep.subr.mxu1 %v2741_v0 }
 0x22d   :  { %2337 = vmatprep.subr.mxu0 %v2741_v0  ;;  %2357 = vmatpush3.msra.mxu1 %v2803_v6 }
 0x22e   :  { %2338 = vmatpush3.msra.mxu0 %v2835_v22  ;;  %2358 = vmatprep.subr.mxu1 %v2741_v0 }
 0x22f   :  { %2339 = vmatprep.subr.mxu0 %v2741_v0  ;;  %2359 = vmatpush3.msra.mxu1 %v2807_v8  ;;  %v830_v8 = vmul.f32 0.9048374, %v3127_v55 }
 0x230   :  { %2340 = vmatpush3.msra.mxu0 %v2839_v24  ;;  %2360 = vmatprep.subr.mxu1 %v2741_v0 }
 0x231   :  { %2341 = vmatprep.subr.mxu0 %v2741_v0  ;;  %2361 = vmatpush3.msra.mxu1 %v2811_v10 }
 0x232   :  { %2342 = vmatpush3.msra.mxu0 %v2843_v26  ;;  %2362 = vmatprep.subr.mxu1 %v2741_v0 }
 0x233   :  { %2343 = vmatprep.subr.mxu0 %v2741_v0  ;;  %2363 = vmatpush3.msra.mxu1 %v2815_v12 }
 0x234   :  { %2344 = vmatpush3.msra.mxu0 %v2847_v28  ;;  %2364 = vmatprep.subr.mxu1 %v2741_v0 }
 0x235   :  { %2345 = vmatprep.subr.mxu0 %v2741_v0  ;;  %2365 = vmatpush3.msra.mxu1 %v2819_v14 }
 0x236   :  { %2346 = vmatpush3.msra.mxu0 %v2851_v30  ;;  %2366 = vmatprep.subr.mxu1 %v2741_v0 }
 0x237   :  { %2347 = vmatprep.subr.mxu0 %v2741_v0  ;;  %2367 = vmatpush3.msra.mxu1 %v2823_v16 }
 0x238   :  { %2348 = vmatpush3.msra.mxu0 %v2855_v32  ;;  %2368 = vmatprep.subr.mxu1 %v2741_v0 }
 0x239   :  { %2369 = vmatpush3.msra.mxu1 %v2827_v18  ;;  %2384 = vmatprep.mubr.msk.f32.mxu1 %vm2742_vm0, %v2741_v0 }
 0x23a   :  { %2370 = vmatprep.subr.mxu1 %v2741_v0  ;;  %2387 = vmatprep.subr.mxu0 %v2741_v0 }
 0x23b   :  { %2371 = vmatpush3.msra.mxu1 %v2831_v20 }
 0x23c   :  { %2372 = vmatprep.subr.mxu1 %v2741_v0 }
 0x23d   :  { %2373 = vmatpush3.msra.mxu1 %v2835_v22  ;;  %v926_v22 = vmul.f32 0.60653067, %v3140_v40  ;;  %v3293_v40 = vld [vmem:[#allocation8 + $0x20] sm:$0xff] }
 0x23e   :  { %2374 = vmatprep.subr.mxu1 %v2741_v0 }
 0x23f   :  { %2375 = vmatpush3.msra.mxu1 %v2839_v24 }
 0x240   :  { %2376 = vmatprep.subr.mxu1 %v2741_v0 }
 0x241   :  { %2377 = vmatpush3.msra.mxu1 %v2843_v26 }
 0x242   :  { %2378 = vmatprep.subr.mxu1 %v2741_v0 }
 0x243   :  { %2379 = vmatpush3.msra.mxu1 %v2847_v28 }
 0x244   :  { %2380 = vmatprep.subr.mxu1 %v2741_v0 }
 0x245   :  { %2381 = vmatpush3.msra.mxu1 %v2851_v30 }
 0x246   :  { %2382 = vmatprep.subr.mxu1 %v2741_v0 }
 0x247   :  { %2383 = vmatpush3.msra.mxu1 %v2855_v32 }
 0x248   :  { %2422 = vmatprep.subr.mxu1 %v2741_v0 }
 0x2d9   :  { %v821_v2 = vpop.f32.mrf.mxu0 }
 0x2da   :  { %v825_v4 = vadd.f32 %v821_v2, %v3007_v58 }
 0x2db   :  { %v2281_v6 = vpop.f32.mrf.mxu0 }
 0x2dc   :  { %v831_v10 = vmul.f32 0.095162585, %v825_v4 }
 0x2de   :  { %v832_v12 = vadd.f32 %v831_v10, %v830_v8 }
 0x2e0   :  { %v833_v14 = vsel %vm3149_vm5, %v832_v12, 0.0 }
 0x2e1   :  { %v1711_v16 = vadd.f32 -0.5, %v833_v14  ;;  %v922_v52 = vmul.f32 0.9048374, %v833_v14 }
 0x2e3   :  { %vm840_vm6 = vcmp.gt.f32.partialorder %v1711_v16, 0.0 }
 0x2e4   :  { %v1712_v18 = vsel %vm840_vm6, 1.0, %v2741_v0 }
 0x2e5   :  { %v927_v20 = vmul.f32 0.016666668, %v1712_v18  ;;  %vm843_vm7 = vcmp.gt.f32.partialorder %v1712_v18, 0.0  ;;  %vm920_vm9 = vcmp.eq.f32.partialorder %v1712_v18, 0.0 }
 0x2e6   :  { %v844_v24 = vsel %vm843_vm7, 6.0, %v3138_v39  ;;  %v3287_v39 = vld [vmem:[#allocation8 + $0x28] sm:$0xff] }
 0x2e7   :  { %v918_v46 = vadd.f32 2.0, %v844_v24  ;;  %v928_v58 = vadd.f32 %v927_v20, %v926_v22 }
 0x2e8   :  { %v913_v48 = vpop.f32.mrf.mxu1 }
 0x2e9   :  { %v917_v49 = vadd.f32 %v3005_v57, %v913_v48  ;;  %vm919_vm8 = vcmp.lt.f32.partialorder %v918_v46, 7.0  ;;  %v930_v50 = vadd.f32 %v929_v47, %v928_v58  ;;  %v3226_v57 = vld [vmem:[#allocation8 + $0x70] sm:$0xff]  ;;  %v1018_v19 = vmul.f32 0.60653067, %v928_v58 }
 0x2ea   :  { %vm921_vm10 = vmand %vm919_vm8, %vm920_vm9  ;;  %v2316_v51 = vpop.f32.mrf.mxu1 }
 0x2eb   :  { %v923_v53 = vmul.f32 0.095162585, %v917_v49  ;;  %v937_v54 = vmax.f32 %v3155_v45, %v930_v50  ;;  %2350 = vmatmul.mubr.f32.vlgmr.msra.gmra.mxu0 %v930_v50  ;;  %v1021_v27 = vmul.f32 0.9672161, %v930_v50 }
 0x2ec   :  { %2388 = vmatpush3.msra.mxu0 %v3220_v3  ;;  %2419 = vmatprep.mubr.msk.f32.mxu0 %vm2742_vm0, %v2741_v0 }
 0x2ed   :  { %v924_v7 = vadd.f32 %v923_v53, %v922_v52  ;;  %2389 = vmatprep.subr.mxu0 %v2741_v0 }
 0x2ee   :  { %2390 = vmatpush3.msra.mxu0 %v3226_v57 }
 0x2ef   :  { %v3229_v9 = vsel %vm921_vm10, %v924_v7, 0.0  ;;  %2391 = vmatprep.subr.mxu0 %v2741_v0 }
 0x2f0   :  { %v1713_v11 = vadd.f32 -0.5, %v3229_v9  ;;  %2392 = vmatpush3.msra.mxu0 %v3233_v13  ;;  %v1014_v44 = vmul.f32 0.9048374, %v3229_v9 }
 0x2f1   :  { %2393 = vmatprep.subr.mxu0 %v2741_v0 }
 0x2f2   :  { %vm932_vm11 = vcmp.gt.f32.partialorder %v1713_v11, 0.0  ;;  %2394 = vmatpush3.msra.mxu0 %v3237_v15 }
 0x2f3   :  { %v1714_v17 = vsel %vm932_vm11, 1.0, %v2741_v0  ;;  %2395 = vmatprep.subr.mxu0 %v2741_v0 }
 0x2f4   :  { %v1019_v56 = vmul.f32 0.016666668, %v1714_v17  ;;  %2396 = vmatpush3.msra.mxu0 %v3242_v21  ;;  %vm935_vm12 = vcmp.gt.f32.partialorder %v1714_v17, 0.0  ;;  %vm1012_vm14 = vcmp.eq.f32.partialorder %v1714_v17, 0.0 }
 0x2f5   :  { %2397 = vmatprep.subr.mxu0 %v2741_v0  ;;  %v3246_v23 = vsel %vm935_vm12, 7.0, %v844_v24 }
 0x2f6   :  { %v3248_v25 = vadd.f32 %v1019_v56, %v1018_v19  ;;  %2398 = vmatpush3.msra.mxu0 %v3250_v29  ;;  %v1010_v31 = vadd.f32 2.0, %v3246_v23 }
 0x2f7   :  { %2399 = vmatprep.subr.mxu0 %v2741_v0 }
 0x2f8   :  { %v3256_v33 = vadd.f32 %v1021_v27, %v3248_v25  ;;  %2400 = vmatpush3.msra.mxu0 %v3258_v34  ;;  %vm1011_vm13 = vcmp.lt.f32.partialorder %v1010_v31, 8.0  ;;  %v1110_v12 = vmul.f32 0.60653067, %v3248_v25 }
 0x2f9   :  { %vm3261_vm15 = vmand %vm1011_vm13, %vm1012_vm14  ;;  %2401 = vmatprep.subr.mxu0 %v2741_v0 }
 0x2fa   :  { %v3267_v35 = vmax.f32 %v937_v54, %v3256_v33  ;;  %2385 = vmatmul.mubr.f32.vlgmr.msra.gmra.mxu1 %v3256_v33  ;;  %2402 = vmatpush3.msra.mxu0 %v3270_v36  ;;  %v1113_v18 = vmul.f32 0.9672161, %v3256_v33 }
 0x2fb   :  { %2403 = vmatprep.subr.mxu0 %v2741_v0  ;;  %2423 = vmatpush3.msra.mxu1 %v3220_v3 }
 0x2fc   :  { %2404 = vmatpush3.msra.mxu0 %v3275_v37  ;;  %2424 = vmatprep.subr.mxu1 %v2741_v0 }
 0x2fd   :  { %2405 = vmatprep.subr.mxu0 %v2741_v0  ;;  %2425 = vmatpush3.msra.mxu1 %v3226_v57 }
 0x2fe   :  { %2406 = vmatpush3.msra.mxu0 %v3281_v38  ;;  %2426 = vmatprep.subr.mxu1 %v2741_v0 }
 0x2ff   :  { %2407 = vmatprep.subr.mxu0 %v2741_v0  ;;  %2427 = vmatpush3.msra.mxu1 %v3233_v13 }
 0x300   :  { %2408 = vmatpush3.msra.mxu0 %v3287_v39  ;;  %2428 = vmatprep.subr.mxu1 %v2741_v0 }
 0x301   :  { %2409 = vmatprep.subr.mxu0 %v2741_v0  ;;  %2429 = vmatpush3.msra.mxu1 %v3237_v15 }
 0x302   :  { %2410 = vmatpush3.msra.mxu0 %v3293_v40  ;;  %2430 = vmatprep.subr.mxu1 %v2741_v0 }
 0x303   :  { %2411 = vmatprep.subr.mxu0 %v2741_v0  ;;  %2431 = vmatpush3.msra.mxu1 %v3242_v21 }
 0x304   :  { %2412 = vmatpush3.msra.mxu0 %v2843_v26  ;;  %2432 = vmatprep.subr.mxu1 %v2741_v0  ;;  %v3324_v26 = vld [vmem:[#allocation8 + $0x18] sm:$0xff] }
 0x305   :  { %2413 = vmatprep.subr.mxu0 %v2741_v0  ;;  %2433 = vmatpush3.msra.mxu1 %v3250_v29 }
 0x306   :  { %2414 = vmatpush3.msra.mxu0 %v2847_v28  ;;  %2434 = vmatprep.subr.mxu1 %v2741_v0  ;;  %v3328_v28 = vld [vmem:[#allocation8 + $0x10] sm:$0xff] }
 0x307   :  { %2415 = vmatprep.subr.mxu0 %v2741_v0  ;;  %2435 = vmatpush3.msra.mxu1 %v3258_v34 }
 0x308   :  { %2416 = vmatpush3.msra.mxu0 %v2851_v30  ;;  %2436 = vmatprep.subr.mxu1 %v2741_v0  ;;  %v3332_v30 = vld [vmem:[#allocation8 + $0x8] sm:$0xff] }
 0x309   :  { %2417 = vmatprep.subr.mxu0 %v2741_v0  ;;  %2437 = vmatpush3.msra.mxu1 %v3270_v36 }
 0x30a   :  { %2418 = vmatpush3.msra.mxu0 %v2855_v32  ;;  %2438 = vmatprep.subr.mxu1 %v2741_v0  ;;  %v3336_v32 = vld [vmem:[#allocation8] sm:$0xff] }
 0x30b   :  { %2439 = vmatpush3.msra.mxu1 %v3275_v37  ;;  %2454 = vmatprep.mubr.msk.f32.mxu1 %vm2742_vm0, %v2741_v0 }
 0x30c   :  { %2440 = vmatprep.subr.mxu1 %v2741_v0  ;;  %2457 = vmatprep.subr.mxu0 %v2741_v0 }
 0x30d   :  { %2441 = vmatpush3.msra.mxu1 %v3281_v38 }
 0x30e   :  { %2442 = vmatprep.subr.mxu1 %v2741_v0 }
 0x30f   :  { %2443 = vmatpush3.msra.mxu1 %v3287_v39 }
 0x310   :  { %2444 = vmatprep.subr.mxu1 %v2741_v0 }
 0x311   :  { %2445 = vmatpush3.msra.mxu1 %v3293_v40 }
 0x312   :  { %2446 = vmatprep.subr.mxu1 %v2741_v0 }
 0x313   :  { %2447 = vmatpush3.msra.mxu1 %v3324_v26 }
 0x314   :  { %2448 = vmatprep.subr.mxu1 %v2741_v0 }
 0x315   :  { %2449 = vmatpush3.msra.mxu1 %v3328_v28 }
 0x316   :  { %2450 = vmatprep.subr.mxu1 %v2741_v0 }
 0x317   :  { %2451 = vmatpush3.msra.mxu1 %v3332_v30 }
 0x318   :  { %2452 = vmatprep.subr.mxu1 %v2741_v0 }
 0x319   :  { %2453 = vmatpush3.msra.mxu1 %v3336_v32 }
 0x31a   :  { %2492 = vmatprep.subr.mxu1 %v2741_v0 }
 0x3ab   :  { %v1005_v41 = vpop.f32.mrf.mxu0 }
 0x3ac   :  { %v1009_v42 = vadd.f32 %v1005_v41, %v3011_v60 }
 0x3ad   :  { %v2351_v43 = vpop.f32.mrf.mxu0 }
 0x3ae   :  { %v1015_v45 = vmul.f32 0.095162585, %v1009_v42 }
 0x3b0   :  { %v1016_v2 = vadd.f32 %v1015_v45, %v1014_v44 }
 0x3b2   :  { %v1017_v4 = vsel %vm3261_vm15, %v1016_v2, 0.0 }
 0x3b3   :  { %v1715_v6 = vadd.f32 -0.5, %v1017_v4  ;;  %v1106_v58 = vmul.f32 0.9048374, %v1017_v4 }
 0x3b5   :  { %vm1024_vm1 = vcmp.gt.f32.partialorder %v1715_v6, 0.0 }
 0x3b6   :  { %v1716_v8 = vsel %vm1024_vm1, 1.0, %v2741_v0 }
 0x3b7   :  { %v1111_v10 = vmul.f32 0.016666668, %v1716_v8  ;;  %vm1027_vm2 = vcmp.gt.f32.partialorder %v1716_v8, 0.0  ;;  %vm1104_vm4 = vcmp.eq.f32.partialorder %v1716_v8, 0.0 }
 0x3b8   :  { %v1028_v14 = vsel %vm1027_vm2, 8.0, %v3246_v23 }
 0x3b9   :  { %v1102_v16 = vadd.f32 2.0, %v1028_v14  ;;  %v1112_v60 = vadd.f32 %v1111_v10, %v1110_v12 }
 0x3ba   :  { %v1097_v20 = vpop.f32.mrf.mxu1 }
 0x3bb   :  { %v1101_v22 = vadd.f32 %v3009_v59, %v1097_v20  ;;  %vm1103_vm3 = vcmp.lt.f32.partialorder %v1102_v16, 9.0  ;;  %v1114_v24 = vadd.f32 %v1113_v18, %v1112_v60  ;;  %v1202_v53 = vmul.f32 0.60653067, %v1112_v60 }
 0x3bc   :  { %vm1105_vm5 = vmand %vm1103_vm3, %vm1104_vm4  ;;  %v2386_v46 = vpop.f32.mrf.mxu1 }
 0x3bd   :  { %v1107_v47 = vmul.f32 0.095162585, %v1101_v22  ;;  %v1121_v48 = vmax.f32 %v3267_v35, %v1114_v24  ;;  %2420 = vmatmul.mubr.f32.vlgmr.msra.gmra.mxu0 %v1114_v24  ;;  %v1205_v9 = vmul.f32 0.9672161, %v1114_v24 }
 0x3be   :  { %2458 = vmatpush3.msra.mxu0 %v3220_v3  ;;  %2489 = vmatprep.mubr.msk.f32.mxu0 %vm2742_vm0, %v2741_v0 }
 0x3bf   :  { %v1108_v49 = vadd.f32 %v1107_v47, %v1106_v58  ;;  %2459 = vmatprep.subr.mxu0 %v2741_v0 }
 0x3c0   :  { %2460 = vmatpush3.msra.mxu0 %v3226_v57 }
 0x3c1   :  { %v3355_v59 = vsel %vm1105_vm5, %v1108_v49, 0.0  ;;  %2461 = vmatprep.subr.mxu0 %v2741_v0 }
 0x3c2   :  { %v1717_v50 = vadd.f32 -0.5, %v3355_v59  ;;  %2462 = vmatpush3.msra.mxu0 %v3233_v13  ;;  %v1198_v31 = vmul.f32 0.9048374, %v3355_v59 }
 0x3c3   :  { %2463 = vmatprep.subr.mxu0 %v2741_v0 }
 0x3c4   :  { %vm1116_vm6 = vcmp.gt.f32.partialorder %v1717_v50, 0.0  ;;  %2464 = vmatpush3.msra.mxu0 %v3237_v15 }
 0x3c5   :  { %v1718_v51 = vsel %vm1116_vm6, 1.0, %v2741_v0  ;;  %2465 = vmatprep.subr.mxu0 %v2741_v0 }
 0x3c6   :  { %v1203_v52 = vmul.f32 0.016666668, %v1718_v51  ;;  %2466 = vmatpush3.msra.mxu0 %v3242_v21  ;;  %vm1119_vm7 = vcmp.gt.f32.partialorder %v1718_v51, 0.0  ;;  %vm1196_vm9 = vcmp.eq.f32.partialorder %v1718_v51, 0.0 }
 0x3c7   :  { %2467 = vmatprep.subr.mxu0 %v2741_v0  ;;  %v3366_v54 = vsel %vm1119_vm7, 9.0, %v1028_v14 }
 0x3c8   :  { %v3368_v7 = vadd.f32 %v1203_v52, %v1202_v53  ;;  %2468 = vmatpush3.msra.mxu0 %v3250_v29  ;;  %v1194_v11 = vadd.f32 2.0, %v3366_v54 }
 0x3c9   :  { %2469 = vmatprep.subr.mxu0 %v2741_v0 }
 0x3ca   :  { %v3374_v17 = vadd.f32 %v1205_v9, %v3368_v7  ;;  %2470 = vmatpush3.msra.mxu0 %v3258_v34  ;;  %vm1195_vm8 = vcmp.lt.f32.partialorder %v1194_v11, 10.0  ;;  %v1294_v44 = vmul.f32 0.60653067, %v3368_v7 }
 0x3cb   :  { %vm3377_vm10 = vmand %vm1195_vm8, %vm1196_vm9  ;;  %2471 = vmatprep.subr.mxu0 %v2741_v0 }
 0x3cc   :  { %v3383_v19 = vmax.f32 %v1121_v48, %v3374_v17  ;;  %2455 = vmatmul.mubr.f32.vlgmr.msra.gmra.mxu1 %v3374_v17  ;;  %2472 = vmatpush3.msra.mxu0 %v3270_v36  ;;  %v1297_v4 = vmul.f32 0.9672161, %v3374_v17 }
 0x3cd   :  { %2473 = vmatprep.subr.mxu0 %v2741_v0  ;;  %2493 = vmatpush3.msra.mxu1 %v3220_v3 }
 0x3ce   :  { %2474 = vmatpush3.msra.mxu0 %v3275_v37  ;;  %2494 = vmatprep.subr.mxu1 %v2741_v0 }
 0x3cf   :  { %2475 = vmatprep.subr.mxu0 %v2741_v0  ;;  %2495 = vmatpush3.msra.mxu1 %v3226_v57 }
 0x3d0   :  { %2476 = vmatpush3.msra.mxu0 %v3281_v38  ;;  %2496 = vmatprep.subr.mxu1 %v2741_v0 }
 0x3d1   :  { %2477 = vmatprep.subr.mxu0 %v2741_v0  ;;  %2497 = vmatpush3.msra.mxu1 %v3233_v13 }
 0x3d2   :  { %2478 = vmatpush3.msra.mxu0 %v3287_v39  ;;  %2498 = vmatprep.subr.mxu1 %v2741_v0 }
 0x3d3   :  { %2479 = vmatprep.subr.mxu0 %v2741_v0  ;;  %2499 = vmatpush3.msra.mxu1 %v3237_v15 }
 0x3d4   :  { %2480 = vmatpush3.msra.mxu0 %v3293_v40  ;;  %2500 = vmatprep.subr.mxu1 %v2741_v0 }
 0x3d5   :  { %2481 = vmatprep.subr.mxu0 %v2741_v0  ;;  %2501 = vmatpush3.msra.mxu1 %v3242_v21 }
 0x3d6   :  { %2482 = vmatpush3.msra.mxu0 %v3324_v26  ;;  %2502 = vmatprep.subr.mxu1 %v2741_v0 }
 0x3d7   :  { %2483 = vmatprep.subr.mxu0 %v2741_v0  ;;  %2503 = vmatpush3.msra.mxu1 %v3250_v29 }
 0x3d8   :  { %2484 = vmatpush3.msra.mxu0 %v3328_v28  ;;  %2504 = vmatprep.subr.mxu1 %v2741_v0 }
 0x3d9   :  { %2485 = vmatprep.subr.mxu0 %v2741_v0  ;;  %2505 = vmatpush3.msra.mxu1 %v3258_v34 }
 0x3da   :  { %2486 = vmatpush3.msra.mxu0 %v3332_v30  ;;  %2506 = vmatprep.subr.mxu1 %v2741_v0 }
 0x3db   :  { %2487 = vmatprep.subr.mxu0 %v2741_v0  ;;  %2507 = vmatpush3.msra.mxu1 %v3270_v36 }
 0x3dc   :  { %2488 = vmatpush3.msra.mxu0 %v3336_v32  ;;  %2508 = vmatprep.subr.mxu1 %v2741_v0 }
 0x3dd   :  { %2509 = vmatpush3.msra.mxu1 %v3275_v37  ;;  %2524 = vmatprep.mubr.msk.f32.mxu1 %vm2742_vm0, %v2741_v0 }
 0x3de   :  { %2510 = vmatprep.subr.mxu1 %v2741_v0  ;;  %2527 = vmatprep.subr.mxu0 %v2741_v0 }
 0x3df   :  { %2511 = vmatpush3.msra.mxu1 %v3281_v38 }
 0x3e0   :  { %2512 = vmatprep.subr.mxu1 %v2741_v0 }
 0x3e1   :  { %2513 = vmatpush3.msra.mxu1 %v3287_v39 }
 0x3e2   :  { %2514 = vmatprep.subr.mxu1 %v2741_v0 }
 0x3e3   :  { %2515 = vmatpush3.msra.mxu1 %v3293_v40 }
 0x3e4   :  { %2516 = vmatprep.subr.mxu1 %v2741_v0 }
 0x3e5   :  { %2517 = vmatpush3.msra.mxu1 %v3324_v26 }
 0x3e6   :  { %2518 = vmatprep.subr.mxu1 %v2741_v0 }
 0x3e7   :  { %2519 = vmatpush3.msra.mxu1 %v3328_v28 }
 0x3e8   :  { %2520 = vmatprep.subr.mxu1 %v2741_v0 }
 0x3e9   :  { %2521 = vmatpush3.msra.mxu1 %v3332_v30 }
 0x3ea   :  { %2522 = vmatprep.subr.mxu1 %v2741_v0 }
 0x3eb   :  { %2523 = vmatpush3.msra.mxu1 %v3336_v32 }
 0x3ec   :  { %2562 = vmatprep.subr.mxu1 %v2741_v0 }
 0x47d   :  { %v1189_v23 = vpop.f32.mrf.mxu0 }
 0x47e   :  { %v1193_v25 = vadd.f32 %v1189_v23, %v3015_v62 }
 0x47f   :  { %v2421_v27 = vpop.f32.mrf.mxu0 }
 0x480   :  { %v1199_v33 = vmul.f32 0.095162585, %v1193_v25 }
 0x482   :  { %v1200_v55 = vadd.f32 %v1199_v33, %v1198_v31 }
 0x484   :  { %v1201_v35 = vsel %vm3377_vm10, %v1200_v55, 0.0 }
 0x485   :  { %v1719_v41 = vadd.f32 -0.5, %v1201_v35  ;;  %v1290_v14 = vmul.f32 0.9048374, %v1201_v35 }
 0x487   :  { %vm1208_vm11 = vcmp.gt.f32.partialorder %v1719_v41, 0.0 }
 0x488   :  { %v1720_v42 = vsel %vm1208_vm11, 1.0, %v2741_v0 }
 0x489   :  { %v1295_v43 = vmul.f32 0.016666668, %v1720_v42  ;;  %vm1211_vm12 = vcmp.gt.f32.partialorder %v1720_v42, 0.0  ;;  %vm1288_vm14 = vcmp.eq.f32.partialorder %v1720_v42, 0.0 }
 0x48a   :  { %v1212_v45 = vsel %vm1211_vm12, 10.0, %v3366_v54 }
 0x48b   :  { %v1286_v2 = vadd.f32 2.0, %v1212_v45  ;;  %v1296_v62 = vadd.f32 %v1295_v43, %v1294_v44 }
 0x48c   :  { %v1281_v6 = vpop.f32.mrf.mxu1 }
 0x48d   :  { %v1285_v8 = vadd.f32 %v3013_v61, %v1281_v6  ;;  %vm1287_vm13 = vcmp.lt.f32.partialorder %v1286_v2, 11.0  ;;  %v1298_v10 = vadd.f32 %v1297_v4, %v1296_v62  ;;  %v1386_v24 = vmul.f32 0.60653067, %v1296_v62  ;;  %v1595_v62 = vld [vmem:[#allocation9 + $0x48] sm:$0xff]  ;;  %v1594_v4 = vld [vmem:[#allocation9 + $0x40] sm:$0xff]  ;;  %v1593_v6 = vld [vmem:[#allocation9 + $0x38] sm:$0xff] }
 0x48e   :  { %vm1289_vm15 = vmand %vm1287_vm13, %vm1288_vm14  ;;  %v2456_v12 = vpop.f32.mrf.mxu1 }
 0x48f   :  { %v1291_v16 = vmul.f32 0.095162585, %v1285_v8  ;;  %v1305_v60 = vmax.f32 %v3383_v19, %v1298_v10  ;;  %2490 = vmatmul.mubr.f32.vlgmr.msra.gmra.mxu0 %v1298_v10  ;;  %v1592_v8 = vld [vmem:[#allocation9 + $0x30] sm:$0xff]  ;;  %v1590_v12 = vld [vmem:[#allocation9 + $0x20] sm:$0xff] }
 0x490   :  { %2528 = vmatpush3.msra.mxu0 %v3220_v3  ;;  %2559 = vmatprep.mubr.msk.f32.mxu0 %vm2742_vm0, %v2741_v0 }
 0x491   :  { %v1292_v18 = vadd.f32 %v1291_v16, %v1290_v14  ;;  %2529 = vmatprep.subr.mxu0 %v2741_v0  ;;  %v1589_v14 = vld [vmem:[#allocation9 + $0x18] sm:$0xff]  ;;  %v1588_v16 = vld [vmem:[#allocation9 + $0x10] sm:$0xff] }
 0x492   :  { %2530 = vmatpush3.msra.mxu0 %v3226_v57 }
 0x493   :  { %v3453_v61 = vsel %vm1289_vm15, %v1292_v18, 0.0  ;;  %2531 = vmatprep.subr.mxu0 %v2741_v0  ;;  %v1586_v18 = vld [vmem:[#allocation9] sm:$0xff] }
 0x494   :  { %v1721_v20 = vadd.f32 -0.5, %v3453_v61  ;;  %2532 = vmatpush3.msra.mxu0 %v3233_v13  ;;  %v1389_v13 = vmul.f32 0.9672161, %v1298_v10  ;;  %v1591_v10 = vld [vmem:[#allocation9 + $0x28] sm:$0xff] }
 0x495   :  { %2533 = vmatprep.subr.mxu0 %v2741_v0 }
 0x496   :  { %vm1300_vm1 = vcmp.gt.f32.partialorder %v1721_v20, 0.0  ;;  %2534 = vmatpush3.msra.mxu0 %v3237_v15 }
 0x497   :  { %v1722_v3 = vsel %vm1300_vm1, 1.0, %v2741_v0  ;;  %2535 = vmatprep.subr.mxu0 %v2741_v0 }
 0x498   :  { %v1387_v22 = vmul.f32 0.016666668, %v1722_v3  ;;  %2536 = vmatpush3.msra.mxu0 %v3242_v21  ;;  %vm1303_vm2 = vcmp.gt.f32.partialorder %v1722_v3, 0.0  ;;  %v1601_v21 = vld [vmem:[#allocation9 + $0x78] sm:$0xff]  ;;  %vm1380_vm3 = vcmp.eq.f32.partialorder %v1722_v3, 0.0 }
 0x499   :  { %2537 = vmatprep.subr.mxu0 %v2741_v0  ;;  %v3464_v57 = vsel %vm1303_vm2, 11.0, %v1212_v45 }
 0x49a   :  { %v1388_v46 = vadd.f32 %v1387_v22, %v1386_v24  ;;  %2538 = vmatpush3.msra.mxu0 %v3250_v29  ;;  %v1600_v29 = vld [vmem:[#allocation9 + $0x70] sm:$0xff] }
 0x49b   :  { %2539 = vmatprep.subr.mxu0 %v2741_v0 }
 0x49c   :  { %v1390_v15 = vadd.f32 %v1389_v13, %v1388_v46  ;;  %2540 = vmatpush3.msra.mxu0 %v3258_v34  ;;  %v1599_v34 = vld [vmem:[#allocation9 + $0x68] sm:$0xff]  ;;  %v1478_v51 = vmul.f32 0.60653067, %v1388_v46 }
 0x49d   :  { %2541 = vmatprep.subr.mxu0 %v2741_v0 }
 0x49e   :  { %v3470_v58 = vmax.f32 %v1305_v60, %v1390_v15  ;;  %2525 = vmatmul.mubr.f32.vlgmr.msra.gmra.mxu1 %v1390_v15  ;;  %2542 = vmatpush3.msra.mxu0 %v3270_v36  ;;  %v1598_v36 = vld [vmem:[#allocation9 + $0x60] sm:$0xff]  ;;  %v1481_v54 = vmul.f32 0.9672161, %v1390_v15  ;;  %v1587_v60 = vld [vmem:[#allocation9 + $0x8] sm:$0xff] }
 0x49f   :  { %2543 = vmatprep.subr.mxu0 %v2741_v0  ;;  %2594 = vmatprep.mubr.msk.f32.mxu1 %vm2742_vm0, %v2741_v0 }
 0x4a0   :  { %2544 = vmatpush3.msra.mxu0 %v3275_v37  ;;  %2563 = vmatpush3.msra.mxu1 %v1601_v21  ;;  %v1597_v37 = vld [vmem:[#allocation9 + $0x58] sm:$0xff] }
 0x4a1   :  { %2545 = vmatprep.subr.mxu0 %v2741_v0  ;;  %2564 = vmatprep.subr.mxu1 %v2741_v0 }
 0x4a2   :  { %2546 = vmatpush3.msra.mxu0 %v3281_v38  ;;  %2565 = vmatpush3.msra.mxu1 %v1600_v29  ;;  %v1596_v38 = vld [vmem:[#allocation9 + $0x50] sm:$0xff] }
 0x4a3   :  { %2547 = vmatprep.subr.mxu0 %v2741_v0  ;;  %2566 = vmatprep.subr.mxu1 %v2741_v0 }
 0x4a4   :  { %2548 = vmatpush3.msra.mxu0 %v3287_v39  ;;  %2567 = vmatpush3.msra.mxu1 %v1599_v34  ;;  %v1378_v39 = vadd.f32 2.0, %v3464_v57 }
 0x4a5   :  { %2549 = vmatprep.subr.mxu0 %v2741_v0  ;;  %2568 = vmatprep.subr.mxu1 %v2741_v0 }
 0x4a6   :  { %2550 = vmatpush3.msra.mxu0 %v3293_v40  ;;  %2569 = vmatpush3.msra.mxu1 %v1598_v36  ;;  %vm1379_vm0 = vcmp.lt.f32.partialorder %v1378_v39, 12.0 }
 0x4a7   :  { %2551 = vmatprep.subr.mxu0 %v2741_v0  ;;  %2570 = vmatprep.subr.mxu1 %v2741_v0  ;;  %vm1381_vm4 = vmand %vm1379_vm0, %vm1380_vm3 }
 0x4a8   :  { %2552 = vmatpush3.msra.mxu0 %v3324_v26  ;;  %2571 = vmatpush3.msra.mxu1 %v1597_v37 }
 0x4a9   :  { %2553 = vmatprep.subr.mxu0 %v2741_v0  ;;  %2572 = vmatprep.subr.mxu1 %v2741_v0 }
 0x4aa   :  { %2554 = vmatpush3.msra.mxu0 %v3328_v28  ;;  %2573 = vmatpush3.msra.mxu1 %v1596_v38  ;;  %v1672_v38 = vlaneseq }
 0x4ab   :  { %2555 = vmatprep.subr.mxu0 %v2741_v0  ;;  %2574 = vmatprep.subr.mxu1 %v2741_v0 }
 0x4ac   :  { %2556 = vmatpush3.msra.mxu0 %v3332_v30  ;;  %v1382_v30 = vmul.f32 0.9048374, %v3453_v61  ;;  %2575 = vmatpush3.msra.mxu1 %v1595_v62 }
 0x4ad   :  { %2557 = vmatprep.subr.mxu0 %v2741_v0  ;;  %2576 = vmatprep.subr.mxu1 %v2741_v0 }
 0x4ae   :  { %2558 = vmatpush3.msra.mxu0 %v3336_v32  ;;  %2577 = vmatpush3.msra.mxu1 %v1594_v4 }
 0x4af   :  { %2578 = vmatprep.subr.mxu1 %v2741_v0 }
 0x4b0   :  { %2579 = vmatpush3.msra.mxu1 %v1593_v6 }
 0x4b1   :  { %2580 = vmatprep.subr.mxu1 %v2741_v0 }
 0x4b2   :  { %2581 = vmatpush3.msra.mxu1 %v1592_v8 }
 0x4b3   :  { %2582 = vmatprep.subr.mxu1 %v2741_v0 }
 0x4b4   :  { %2583 = vmatpush3.msra.mxu1 %v1591_v10 }
 0x4b5   :  { %2584 = vmatprep.subr.mxu1 %v2741_v0 }
 0x4b6   :  { %2585 = vmatpush3.msra.mxu1 %v1590_v12 }
 0x4b7   :  { %2586 = vmatprep.subr.mxu1 %v2741_v0 }
 0x4b8   :  { %2587 = vmatpush3.msra.mxu1 %v1589_v14 }
 0x4b9   :  { %2588 = vmatprep.subr.mxu1 %v2741_v0 }
 0x4ba   :  { %2589 = vmatpush3.msra.mxu1 %v1588_v16 }
 0x4bb   :  { %2590 = vmatprep.subr.mxu1 %v2741_v0 }
 0x4bc   :  { %2591 = vmatpush3.msra.mxu1 %v1587_v60 }
 0x4bd   :  { %2592 = vmatprep.subr.mxu1 %v2741_v0 }
 0x4be   :  { %2593 = vmatpush3.msra.mxu1 %v1586_v18 }
 0x54f   :  { %v1373_v40 = vpop.f32.mrf.mxu0 }
 0x550   :  { %v1377_v26 = vadd.f32 %v1373_v40, %v3019_v1 }
 0x551   :  { %v2491_v28 = vpop.f32.mrf.mxu0 }
 0x552   :  { %v1383_v32 = vmul.f32 0.095162585, %v1377_v26 }
 0x554   :  { %v1384_v47 = vadd.f32 %v1383_v32, %v1382_v30 }
 0x556   :  { %v1385_v48 = vsel %vm1381_vm4, %v1384_v47, 0.0 }
 0x557   :  { %v1723_v49 = vadd.f32 -0.5, %v1385_v48  ;;  %v1474_v56 = vmul.f32 0.9048374, %v1385_v48 }
 0x559   :  { %vm1392_vm5 = vcmp.gt.f32.partialorder %v1723_v49, 0.0 }
 0x55a   :  { %v1724_v59 = vsel %vm1392_vm5, 1.0, %v2741_v0 }
 0x55b   :  { %v1479_v50 = vmul.f32 0.016666668, %v1724_v59  ;;  %vm1395_vm6 = vcmp.gt.f32.partialorder %v1724_v59, 0.0  ;;  %vm1472_vm8 = vcmp.eq.f32.partialorder %v1724_v59, 0.0 }
 0x55c   :  { %v1396_v52 = vsel %vm1395_vm6, 12.0, %v3464_v57 }
 0x55d   :  { %v1470_v53 = vadd.f32 2.0, %v1396_v52  ;;  %v1480_v1 = vadd.f32 %v1479_v50, %v1478_v51 }
 0x55e   :  { %v1465_v7 = vpop.f32.mrf.mxu1 }
 0x55f   :  { %v1469_v9 = vadd.f32 %v3017_v63, %v1465_v7  ;;  %v1482_v11 = vadd.f32 %v1481_v54, %v1480_v1  ;;  %vm1471_vm7 = vcmp.lt.f32.partialorder %v1470_v53, 13.0  ;;  %v1570_v35 = vmul.f32 0.60653067, %v1480_v1 }
 0x560   :  { %v2526_v17 = vpop.f32.mrf.mxu1  ;;  %vm1473_vm9 = vmand %vm1471_vm7, %vm1472_vm8 }
 0x561   :  { %v1475_v19 = vmul.f32 0.095162585, %v1469_v9  ;;  %2560 = vmatmul.mubr.f32.vlgmr.msra.gmra.mxu0 %v1482_v11  ;;  %v1489_v23 = vmax.f32 %v3470_v58, %v1482_v11  ;;  %v1573_v41 = vmul.f32 0.9672161, %v1482_v11 }
 0x563   :  { %v1476_v25 = vadd.f32 %v1475_v19, %v1474_v56 }
 0x565   :  { %v1477_v27 = vsel %vm1473_vm9, %v1476_v25, 0.0 }
 0x566   :  { %v1725_v31 = vadd.f32 -0.5, %v1477_v27  ;;  %v1566_v22 = vmul.f32 0.9048374, %v1477_v27 }
 0x568   :  { %vm1484_vm10 = vcmp.gt.f32.partialorder %v1725_v31, 0.0 }
 0x569   :  { %v1726_v33 = vsel %vm1484_vm10, 1.0, %v2741_v0 }
 0x56a   :  { %v1571_v55 = vmul.f32 0.016666668, %v1726_v33  ;;  %vm1487_vm11 = vcmp.gt.f32.partialorder %v1726_v33, 0.0  ;;  %vm1564_vm13 = vcmp.eq.f32.partialorder %v1726_v33, 0.0 }
 0x56b   :  { %v1488_v63 = vsel %vm1487_vm11, 13.0, %v1396_v52 }
 0x56c   :  { %v1562_v42 = vadd.f32 2.0, %v1488_v63  ;;  %v1572_v43 = vadd.f32 %v1571_v55, %v1570_v35 }
 0x56e   :  { %vm1563_vm12 = vcmp.lt.f32.partialorder %v1562_v42, 14.0  ;;  %v1574_v44 = vadd.f32 %v1573_v41, %v1572_v43  ;;  %v1580_v58 = vmul.f32 0.60653067, %v1572_v43 }
 0x56f   :  { %vm3505_vm14 = vmand %vm1563_vm12, %vm1564_vm13 }
 0x570   :  { %v1579_v2 = vmax.f32 %v1489_v23, %v1574_v44  ;;  %v1583_v34 = vmul.f32 0.9672161, %v1574_v44 }
 0x621   :  { %v1557_v61 = vpop.f32.mrf.mxu0 }
 0x622   :  { %v1561_v20 = vadd.f32 %v1557_v61, %v3021_v5  ;;  %v1673_v5 = vand.u32 127, %v1672_v38 }
 0x623   :  { %v2561_v3 = vpop.f32.mrf.mxu0 }
 0x624   :  { %v1567_v24 = vmul.f32 0.095162585, %v1561_v20  ;;  %vm1674_vm1 = vcmp.lt.s32.totalorder %v1673_v5, 10 }
 0x626   :  { %v1568_v57 = vadd.f32 %v1567_v24, %v1566_v22 }
 0x628   :  { %v1569_v46 = vsel %vm3505_vm14, %v1568_v57, 0.0 }
 0x629   :  { %v1727_v13 = vadd.f32 -0.5, %v1569_v46 }
 0x62b   :  { %vm1576_vm15 = vcmp.gt.f32.partialorder %v1727_v13, 0.0 }
 0x62c   :  { %v1728_v15 = vsel %vm1576_vm15, 1.0, %v2741_v0 }
 0x62d   :  { %v1581_v21 = vmul.f32 0.016666668, %v1728_v15 }
 0x62f   :  { %v1582_v29 = vadd.f32 %v1581_v21, %v1580_v58 }
 0x631   :  { %v1584_v36 = vadd.f32 %v1583_v34, %v1582_v29 }
 0x633   :  { %v1585_v37 = vmax.f32 %v1579_v2, %v1584_v36 }
 0x635   :  { %2595 = vmatmul.mubr.f32.vlgmr.msra.gmra.mxu1 %v1585_v37 }
 0x6f5   :  { %v1668_v39 = vpop.f32.mrf.mxu1 }
 0x6f6   :  { %v1675_v40 = vsel %vm1674_vm1, %v1668_v39, -inf }
 0x6f7   :  { %1676 = vmax.xlane.f32.xlu0 %v1675_v40  ;;  %v2596_v26 = vpop.f32.mrf.mxu1 }
 0x780   :  { %v1677_v28 = vpop.xlane.xlu0 %1676 }
 0x781   :  { %v1678_v30 = vsub.f32 %v1675_v40, %v1677_v28 }
 0x783   :  { %v1679_v32 = vmul.f32 1.442695, %v1678_v30 }
 0x785   :  { %2607 = vpow2.f32 %v1679_v32 }
 0x792   :  { %v2608_v47 = vpop.eup %2607 }
 0x793   :  { %1681 = vadd.xlane.f32.xlu0 %v2608_v47 }
 0x81c   :  { %v1682_v0 = vpop.xlane.xlu0 %1681 }
 0x81d   :  { %2609 = vrcp.f32 %v1682_v0 }
 0x82a   :  { %v2610_v48 = vpop.eup %2609 }
 0x82b   :  { %v1684_v49 = vmul.f32 %v2610_v48, %v2608_v47 }
 0x82d   :  { %1685 = vst [vmem:[#allocation11] sm:$0xff] %v1684_v49 }
 0x82e   :  { %2718 = shalt.err (!%p2715_p10)
}
 0x82f   :  { %1695 = dma.vmem_to_hbm [thread:$0]  %s1693_s3, 128, %s3529_s4, [#allocation5]  }
 0x830   :  { %2733 = dma.done.wait [#allocation5], 128  }
 0x831   :  { %2734 = vsyncadd [#allocation5], 4294967168 }
 0x832   :  { %1699 = vsyncpa [#allocation4], 1 }
 0x833   :  { %1700 = vsyncpa [#allocation7], 1 }
 0x834   :  { %1701 = vsyncpa [#allocation10], 1 }
 0x835   :  { %1702 = vsyncpa [#allocation5], 1 }

</bundles_post_ra>
